<compile_context>
chip_gen: v7x
topology: tpu7x:2x2x1
jax: 0.10.0
libtpu: 0.0.40
codegen_flags: <defaults>
</compile_context>

<pallas_src>
import functools

import jax
import jax.numpy as jnp
from jax import lax
from jax.experimental import pallas as pl
from jax.experimental.pallas import tpu as pltpu

PITCH_RANGE = 128
LRELU_SLOPE = 0.2
BN_EPS = 1e-5

# ---------------------------------------------------------------------------
# Packed parameter layouts: the kernel receives exactly three parameter arrays.
# ---------------------------------------------------------------------------
# (a) "vec" slab: every bias / BN gamma / BN beta as one f32 row, width-padded
#     to 256 lanes.  One DMA instead of ~30 tiny ones.
VEC_SPECS = (
    ("h0p_b", 16), ("bn0p_g", 16), ("bn0p_b", 16),
    ("h1p_b", 48), ("bn1p_g", 48), ("bn1p_b", 48),
    ("h2p_b", 64), ("bn2p_g", 64), ("bn2p_b", 64),
    ("h3p_b", 128), ("bn3p_g", 128), ("bn3p_b", 128),
    ("lin_b", 256), ("bn1d_g", 256), ("bn1d_b", 256),
    ("d1_b", 128), ("bn2_g", 128), ("bn2_b", 128),
    ("d2_b", 128), ("bn3_g", 128), ("bn3_b", 128),
    ("d3_b", 128), ("bn4_g", 128), ("bn4_b", 128),
    ("h4_b", 128),
)
VEC_ROW = {name: i for i, (name, _) in enumerate(VEC_SPECS)}
VEC_WIDTH = dict(VEC_SPECS)

# (b) slab_a: the <=128-lane matmul weights (conv branch taps + final h4
#     deconv), bf16, stacked along sublanes.  name -> (row_start, rows, cols).
#     Row starts are multiples of 16 (packed bf16 tile is (16,128)).
SLAB_A = {
    "h0p":    (0,   128, 16),    # Conv2d(1,16,(1,P)) as (P,16)
    "h1p_t0": (128,  32, 48),    # Conv2d(32,48,(2,1)) tap 0
    "h1p_t1": (160,  32, 48),    # Conv2d(32,48,(2,1)) tap 1
    "h2p_t0": (192,  48, 64),
    "h2p_t1": (240,  48, 64),
    "h3p_t0": (288,  64, 128),
    "h3p_t1": (352,  64, 128),
    "h4":     (416, 160, 128),   # ConvTranspose2d(160,1,(1,P)) as (160,P)
}
SLAB_A_ROWS = 576

# (c) slab_b: the 256-lane weights, bf16.  linear1 plus the three (2,1)
#     deconvs with their two kernel taps lane-concatenated ([W_t0 | W_t1]) and
#     the conv_prev_concat input-channel split kept stacked along rows.
SLAB_B = {
    "lin": (0,   100, 256),      # Linear(100,256), columns pre-permuted
    "d1":  (112, 256, 256),      # ConvTranspose2d(256,128,(2,1))
    "d2":  (368, 192, 256),      # ConvTranspose2d(192,128,(2,1))
    "d3":  (560, 176, 256),      # ConvTranspose2d(176,128,(2,1))
}
SLAB_B_ROWS = 736


# ---------------------------------------------------------------------------
# Fused Pallas kernel: entire generator forward pass in one invocation
# ---------------------------------------------------------------------------
def _fused_generator_kernel(z_ref, prevx_ref, ymap_ref, vec_ref, wa_ref, wb_ref,
                            o_ref,
                            cat0_buf, h1p_buf, h2p_buf,
                            lin_buf, d1_buf, d2_buf, d3_buf,
                            *, batch):
    B = batch
    f32 = jnp.float32
    bf16 = jnp.bfloat16

    def vrow(name):
        r = VEC_ROW[name]
        return vec_ref[r:r + 1, 0:VEC_WIDTH[name]]                  # (1, w) f32

    def wA(name):
        r, n, c = SLAB_A[name]
        return wa_ref[r:r + n, 0:c]                                  # bf16

    def wB(name):
        r, n, c = SLAB_B[name]
        return wb_ref[r:r + n, 0:c]                                  # bf16

    def mm(x, w):
        # bf16 x bf16 -> f32 MXU matmul (weights are already bf16).
        return jnp.dot(x.astype(bf16), w, preferred_element_type=f32)

    def bn_lrelu(x, gname, bname):
        # Training-mode BatchNorm (batch stats, biased var, eps=1e-5) with
        # single-pass E[x^2]-mean^2 statistics, then LeakyReLU(0.2).  f32.
        mean = jnp.mean(x, axis=0, keepdims=True)
        var = jnp.mean(x * x, axis=0, keepdims=True) - mean * mean
        var = jnp.maximum(var, 0.0)
        y = (x - mean) * lax.rsqrt(var + BN_EPS) * vrow(gname) + vrow(bname)
        return jnp.where(y > 0, y, LRELU_SLOPE * y)

    # ----- "prev" (conv) branch ---------------------------------------------
    # h0_prev = lrelu(bn0_prev(Conv2d(1,16,(1,P))(prev_x)))         (B*16, 16)
    h0p = mm(prevx_ref[...], wA("h0p")) + vrow("h0p_b")
    h0p = bn_lrelu(h0p, "bn0p_g", "bn0p_b")
    # torch.cat((h0_prev, y), 1) written once to VMEM scratch; the stride-2
    # convs and the final h4 matmul read it back (no gather matmuls anywhere).
    cat0_buf[...] = jnp.concatenate([h0p, ymap_ref[...]], axis=1)   # (B*16, 32)

    def conv_s2(src_buf, rows_out, w0, w1, b):
        # Conv2d(.,.,(2,1),stride 2): out[h] = x[2h]@W0 + x[2h+1]@W1 + b.
        # Row pairing via sublane-strided loads from VMEM scratch.
        x_e = src_buf[pl.ds(0, rows_out, stride=2), :]
        x_o = src_buf[pl.ds(1, rows_out, stride=2), :]
        return mm(x_e, wA(w0)) + mm(x_o, wA(w1)) + vrow(b)

    h1p = bn_lrelu(conv_s2(cat0_buf, B * 8, "h1p_t0", "h1p_t1", "h1p_b"),
                   "bn1p_g", "bn1p_b")                              # (B*8, 48)
    h1p_buf[...] = h1p
    h2p = bn_lrelu(conv_s2(h1p_buf, B * 4, "h2p_t0", "h2p_t1", "h2p_b"),
                   "bn2p_g", "bn2p_b")                              # (B*4, 64)
    h2p_buf[...] = h2p
    h3p = bn_lrelu(conv_s2(h2p_buf, B * 2, "h3p_t0", "h3p_t1", "h3p_b"),
                   "bn3p_g", "bn3p_b")                              # (B*2, 128)

    # ----- latent branch ------------------------------------------------------
    # h0 = lrelu(bn1d_1(linear1(z)))  -- linear columns pre-permuted so
    # [:, :128] is the h=0 half and [:, 128:] the h=1 half of h0.view(B,128,2,1)
    h0 = mm(z_ref[...], wB("lin")) + vrow("lin_b")
    h0 = bn_lrelu(h0, "bn1d_g", "bn1d_b")                           # (B, 256)
    # Interleave the two halves into natural (b, h) row order via strided stores.
    lin_buf[pl.ds(0, B, stride=2), :] = h0[:, 0:128]
    lin_buf[pl.ds(1, B, stride=2), :] = h0[:, 128:256]              # (B*2, 128)

    # ----- deconv chain -------------------------------------------------------
    def deconv(x_d, x_p, w_name, dst_buf, rows_in):
        # ConvTranspose2d kernel (2,1), stride 2, with conv_prev_concat and the
        # two kernel taps folded into ONE matmul: [x_d | x_p] @ [W_t0 | W_t1].
        x_cat = jnp.concatenate([x_d.astype(bf16), x_p.astype(bf16)], axis=1)
        o = jnp.dot(x_cat, wB(w_name), preferred_element_type=f32)  # (rows, 256)
        # tap k output goes to row 2h+k: sublane-strided scatter into scratch.
        dst_buf[pl.ds(0, rows_in, stride=2), :] = o[:, 0:128]
        dst_buf[pl.ds(1, rows_in, stride=2), :] = o[:, 128:256]

    deconv(lin_buf[...], h3p, "d1", d1_buf, B * 2)
    h2 = bn_lrelu(d1_buf[...] + vrow("d1_b"), "bn2_g", "bn2_b")     # (B*4, 128)
    deconv(h2, h2p_buf[...], "d2", d2_buf, B * 4)
    h3 = bn_lrelu(d2_buf[...] + vrow("d2_b"), "bn3_g", "bn3_b")     # (B*8, 128)
    deconv(h3, h1p_buf[...], "d3", d3_buf, B * 8)
    h4 = bn_lrelu(d3_buf[...] + vrow("d3_b"), "bn4_g", "bn4_b")     # (B*16, 128)

    # ----- h4: ConvTranspose2d(160, 1, (1, P)) + sigmoid ----------------------
    x_cat = jnp.concatenate([h4.astype(bf16), cat0_buf[...].astype(bf16)],
                            axis=1)                                 # (B*16, 160)
    gx = jnp.dot(x_cat, wA("h4"), preferred_element_type=f32) + vrow("h4_b")
    o_ref[...] = jax.nn.sigmoid(gx)                                 # (B*16, 128)


# ---------------------------------------------------------------------------
# Parameters: synthetic torch-layout weights + conversion to packed slabs
# ---------------------------------------------------------------------------
def init_params(key):
    """Deterministic synthetic parameters in (near-)torch layouts."""
    P = PITCH_RANGE
    s = 0.05
    keys = iter(jax.random.split(key, 64))
    nk = lambda: next(keys)
    pr = {}
    pr["emb"] = s * jax.random.normal(nk(), (25, 256), jnp.float32)

    # Conv2d weights (C_out, C_in, kH) / (C_out, kW) with width axis squeezed.
    pr["h0_prev_w"] = s * jax.random.normal(nk(), (16, P), jnp.float32)
    pr["h0_prev_b"] = s * jax.random.normal(nk(), (16,), jnp.float32)
    pr["h1_prev_w"] = s * jax.random.normal(nk(), (48, 32, 2), jnp.float32)
    pr["h1_prev_b"] = s * jax.random.normal(nk(), (48,), jnp.float32)
    pr["h2_prev_w"] = s * jax.random.normal(nk(), (64, 48, 2), jnp.float32)
    pr["h2_prev_b"] = s * jax.random.normal(nk(), (64,), jnp.float32)
    pr["h3_prev_w"] = s * jax.random.normal(nk(), (128, 64, 2), jnp.float32)
    pr["h3_prev_b"] = s * jax.random.normal(nk(), (128,), jnp.float32)

    pr["linear1_w"] = s * jax.random.normal(nk(), (256, 100), jnp.float32)
    pr["linear1_b"] = s * jax.random.normal(nk(), (256,), jnp.float32)

    # ConvTranspose2d weights (C_in, C_out, kH) / (C_in, kW), width squeezed.
    pr["h1_w"] = s * jax.random.normal(nk(), (256, 128, 2), jnp.float32)
    pr["h1_b"] = s * jax.random.normal(nk(), (128,), jnp.float32)
    pr["h2_w"] = s * jax.random.normal(nk(), (192, 128, 2), jnp.float32)
    pr["h2_b"] = s * jax.random.normal(nk(), (128,), jnp.float32)
    pr["h3_w"] = s * jax.random.normal(nk(), (176, 128, 2), jnp.float32)
    pr["h3_b"] = s * jax.random.normal(nk(), (128,), jnp.float32)
    pr["h4_w"] = s * jax.random.normal(nk(), (160, P), jnp.float32)
    pr["h4_b"] = s * jax.random.normal(nk(), (1,), jnp.float32)

    def bn(n):
        g = 1.0 + 0.1 * jax.random.normal(nk(), (n,), jnp.float32)
        b = 0.1 * jax.random.normal(nk(), (n,), jnp.float32)
        return g, b

    pr["bn0_prev"] = bn(16)
    pr["bn1_prev"] = bn(48)
    pr["bn2_prev"] = bn(64)
    pr["bn3_prev"] = bn(128)
    pr["bn2"] = bn(128)
    pr["bn3"] = bn(128)
    pr["bn4"] = bn(128)
    pr["bn1d_1"] = bn(256)
    return pr


def prepare_kernel_params(pr):
    """Pack torch-layout params into: permuted embedding table, one f32
    bias/BN slab, and two bf16 weight slabs (the only kernel param inputs)."""
    kp = {}

    # Embedding with the y.view(B,16,16,1) channel/height transpose pre-folded:
    # emb_perm[i, h, c] = emb[i, c*16 + h].
    kp["emb_perm"] = pr["emb"].reshape(25, 16, 16).transpose(0, 2, 1)

    # Column permutation absorbing h0.view(B, 128, 2, 1): kernel feature
    # h*128 + c corresponds to torch feature c*2 + h.
    perm = (jnp.arange(256) % 128) * 2 + (jnp.arange(256) // 128)

    vec_vals = {
        "h0p_b": pr["h0_prev_b"],
        "bn0p_g": pr["bn0_prev"][0], "bn0p_b": pr["bn0_prev"][1],
        "h1p_b": pr["h1_prev_b"],
        "bn1p_g": pr["bn1_prev"][0], "bn1p_b": pr["bn1_prev"][1],
        "h2p_b": pr["h2_prev_b"],
        "bn2p_g": pr["bn2_prev"][0], "bn2p_b": pr["bn2_prev"][1],
        "h3p_b": pr["h3_prev_b"],
        "bn3p_g": pr["bn3_prev"][0], "bn3p_b": pr["bn3_prev"][1],
        "lin_b": pr["linear1_b"][perm],
        "bn1d_g": pr["bn1d_1"][0][perm], "bn1d_b": pr["bn1d_1"][1][perm],
        "d1_b": pr["h1_b"], "bn2_g": pr["bn2"][0], "bn2_b": pr["bn2"][1],
        "d2_b": pr["h2_b"], "bn3_g": pr["bn3"][0], "bn3_b": pr["bn3"][1],
        "d3_b": pr["h3_b"], "bn4_g": pr["bn4"][0], "bn4_b": pr["bn4"][1],
        "h4_b": jnp.broadcast_to(pr["h4_b"], (128,)),
    }
    vec = jnp.zeros((len(VEC_SPECS), 256), jnp.float32)
    for name, width in VEC_SPECS:
        vec = vec.at[VEC_ROW[name], :width].set(vec_vals[name].astype(jnp.float32))
    kp["vec"] = vec

    slab_a_vals = {
        "h0p": pr["h0_prev_w"].T,                   # (P, 16)
        "h1p_t0": pr["h1_prev_w"][:, :, 0].T,       # (32, 48)
        "h1p_t1": pr["h1_prev_w"][:, :, 1].T,
        "h2p_t0": pr["h2_prev_w"][:, :, 0].T,       # (48, 64)
        "h2p_t1": pr["h2_prev_w"][:, :, 1].T,
        "h3p_t0": pr["h3_prev_w"][:, :, 0].T,       # (64, 128)
        "h3p_t1": pr["h3_prev_w"][:, :, 1].T,
        "h4": pr["h4_w"],                           # (160, P)
    }
    slab_a = jnp.zeros((SLAB_A_ROWS, 128), jnp.float32)
    for name, (r, n, c) in SLAB_A.items():
        slab_a = slab_a.at[r:r + n, :c].set(slab_a_vals[name])
    kp["slab_a"] = slab_a.astype(jnp.bfloat16)

    # Deconv weights: lane-concatenate the two kernel taps, keep the
    # conv_prev_concat input-channel order (chain channels first) along rows.
    slab_b_vals = {
        "lin": pr["linear1_w"].T[:, perm],                                      # (100, 256)
        "d1": jnp.concatenate([pr["h1_w"][:, :, 0], pr["h1_w"][:, :, 1]], 1),   # (256, 256)
        "d2": jnp.concatenate([pr["h2_w"][:, :, 0], pr["h2_w"][:, :, 1]], 1),   # (192, 256)
        "d3": jnp.concatenate([pr["h3_w"][:, :, 0], pr["h3_w"][:, :, 1]], 1),   # (176, 256)
    }
    slab_b = jnp.zeros((SLAB_B_ROWS, 256), jnp.float32)
    for name, (r, n, c) in SLAB_B.items():
        slab_b = slab_b.at[r:r + n, :c].set(slab_b_vals[name])
    kp["slab_b"] = slab_b.astype(jnp.bfloat16)
    return kp


# ---------------------------------------------------------------------------
# Forward: minimal XLA glue (one embedding gather + free reshapes) + 1 kernel
# ---------------------------------------------------------------------------
def forward(kp, z, prev_x, y_ids):
    B = z.shape[0]
    P = PITCH_RANGE

    # Embedding + y.view(B,16,16,1): the transpose is pre-folded into the
    # table, so this is a single gather followed by free reshapes.
    y_map = kp["emb_perm"][y_ids].reshape(B * 16, 16)               # (B*16, 16)
    x_prev = prev_x.reshape(B * 16, P)                              # (B*16, P)

    inputs = [z.astype(jnp.float32), x_prev.astype(jnp.float32),
              y_map.astype(jnp.float32),
              kp["vec"], kp["slab_a"], kp["slab_b"]]

    scratch = [
        pltpu.VMEM((B * 16, 32), jnp.float32),    # cat(h0_prev, y)
        pltpu.VMEM((B * 8, 48), jnp.float32),     # h1_prev
        pltpu.VMEM((B * 4, 64), jnp.float32),     # h2_prev
        pltpu.VMEM((B * 2, 128), jnp.float32),    # h1 (reshaped linear output)
        pltpu.VMEM((B * 4, 128), jnp.float32),    # deconv h1 pre-activation
        pltpu.VMEM((B * 8, 128), jnp.float32),    # deconv h2 pre-activation
        pltpu.VMEM((B * 16, 128), jnp.float32),   # deconv h3 pre-activation
    ]

    gx = pl.pallas_call(
        functools.partial(_fused_generator_kernel, batch=B),
        out_shape=jax.ShapeDtypeStruct((B * 16, P), jnp.float32),
        grid=(1,),
        in_specs=[pl.BlockSpec(a.shape, lambda i: (0, 0)) for a in inputs],
        out_specs=pl.BlockSpec((B * 16, P), lambda i: (0, 0)),
        scratch_shapes=scratch,
        compiler_params=pltpu.CompilerParams(
            dimension_semantics=("arbitrary",)),
    )(*inputs)

    return gx.reshape(B, 1, 16, P)                                  # NCHW output


# ---------------------------------------------------------------------------
if __name__ == "__main__":
    key = jax.random.PRNGKey(0)
    k_params, kz, kx, ky = jax.random.split(key, 4)
    B = 2

    torch_params = init_params(k_params)
    kparams = prepare_kernel_params(torch_params)

    z = jax.random.normal(kz, (B, 100), jnp.float32)
    prev_x = jax.random.normal(kx, (B, 1, 16, PITCH_RANGE), jnp.float32)
    y_ids = jax.random.randint(ky, (B,), 0, 25)

    g_x = jax.jit(forward)(kparams, z, prev_x, y_ids)
    g_x = jax.block_until_ready(g_x)

    assert g_x.shape == (B, 1, 16, PITCH_RANGE), g_x.shape
    assert g_x.dtype == jnp.float32
    assert bool(jnp.all((g_x >= 0.0) & (g_x <= 1.0)))
    assert bool(jnp.all(jnp.isfinite(g_x)))
    print("KERNEL_OK")
</pallas_src>

<mosaic_0001>
module attributes {stable_mosaic.version = 11 : i64} {
  func.func @_fused_generator_kernel(%arg0: i32, %arg1: memref<2x100xf32, #tpu.memory_space<vmem>>, %arg2: memref<32x128xf32, #tpu.memory_space<vmem>>, %arg3: memref<32x16xf32, #tpu.memory_space<vmem>>, %arg4: memref<25x256xf32, #tpu.memory_space<vmem>>, %arg5: memref<576x128xbf16, #tpu.memory_space<vmem>>, %arg6: memref<736x256xbf16, #tpu.memory_space<vmem>>, %arg7: memref<32x128xf32, #tpu.memory_space<vmem>>, %arg8: memref<32x32xf32, #tpu.memory_space<vmem>>, %arg9: memref<16x48xf32, #tpu.memory_space<vmem>>, %arg10: memref<8x64xf32, #tpu.memory_space<vmem>>, %arg11: memref<4x128xf32, #tpu.memory_space<vmem>>, %arg12: memref<8x128xf32, #tpu.memory_space<vmem>>, %arg13: memref<16x128xf32, #tpu.memory_space<vmem>>, %arg14: memref<32x128xf32, #tpu.memory_space<vmem>>) attributes {dimension_semantics = [#tpu.dimension_semantics<arbitrary>], iteration_bounds = array<i64: 1>, scalar_prefetch = 0 : i64, scratch_operands = 7 : i64, tpu.core_type = #tpu.core_type<tc>, window_params = [{pipeline_mode = #tpu.pipeline_mode<synchronous>, transform_indices = @transform_0, window_bounds = array<i64: 2, 100>}, {pipeline_mode = #tpu.pipeline_mode<synchronous>, transform_indices = @transform_1, window_bounds = array<i64: 32, 128>}, {pipeline_mode = #tpu.pipeline_mode<synchronous>, transform_indices = @transform_2, window_bounds = array<i64: 32, 16>}, {pipeline_mode = #tpu.pipeline_mode<synchronous>, transform_indices = @transform_3, window_bounds = array<i64: 25, 256>}, {pipeline_mode = #tpu.pipeline_mode<synchronous>, transform_indices = @transform_4, window_bounds = array<i64: 576, 128>}, {pipeline_mode = #tpu.pipeline_mode<synchronous>, transform_indices = @transform_5, window_bounds = array<i64: 736, 256>}, {pipeline_mode = #tpu.pipeline_mode<synchronous>, transform_indices = @transform_6, window_bounds = array<i64: 32, 128>}]} {
    %c0 = arith.constant 0 : index
    %c0_0 = arith.constant 0 : index
    %0 = vector.load %arg2[%c0, %c0_0] : memref<32x128xf32, #tpu.memory_space<vmem>>, vector<32x128xf32>
    %c0_1 = arith.constant 0 : index
    %c0_2 = arith.constant 0 : index
    %1 = vector.load %arg5[%c0_1, %c0_2] : memref<576x128xbf16, #tpu.memory_space<vmem>>, vector<128x16xbf16>
    %2 = arith.truncf %0 : vector<32x128xf32> to vector<32x128xbf16>
    %cst = arith.constant dense<0.000000e+00> : vector<32x16xf32>
    %3 = tpu.matmul %2, %1, %cst {dimension_numbers = #tpu.dot_dimension_numbers<[1], [0], [0], [1], [0, 0, 1, 1], [], []>} : vector<32x128xbf16>, vector<128x16xbf16>, vector<32x16xf32> -> vector<32x16xf32>
    %c0_3 = arith.constant 0 : index
    %c0_4 = arith.constant 0 : index
    %4 = vector.load %arg4[%c0_3, %c0_4] : memref<25x256xf32, #tpu.memory_space<vmem>>, vector<1x16xf32>
    %5 = vector.broadcast %4 : vector<1x16xf32> to vector<32x16xf32>
    %6 = arith.addf %3, %5 : vector<32x16xf32>
    %cst_5 = arith.constant dense<0.000000e+00> : vector<16xf32>
    %7 = vector.multi_reduction <add>, %6, %cst_5 [0] : vector<32x16xf32> to vector<16xf32>
    %8 = vector.shape_cast %7 : vector<16xf32> to vector<1x16xf32>
    %cst_6 = arith.constant 3.200000e+01 : f32
    %9 = vector.broadcast %cst_6 : f32 to vector<1x16xf32>
    %10 = arith.divf %8, %9 : vector<1x16xf32>
    %11 = arith.mulf %6, %6 : vector<32x16xf32>
    %cst_7 = arith.constant dense<0.000000e+00> : vector<16xf32>
    %12 = vector.multi_reduction <add>, %11, %cst_7 [0] : vector<32x16xf32> to vector<16xf32>
    %13 = vector.shape_cast %12 : vector<16xf32> to vector<1x16xf32>
    %cst_8 = arith.constant 3.200000e+01 : f32
    %14 = vector.broadcast %cst_8 : f32 to vector<1x16xf32>
    %15 = arith.divf %13, %14 : vector<1x16xf32>
    %16 = arith.mulf %10, %10 : vector<1x16xf32>
    %17 = arith.subf %15, %16 : vector<1x16xf32>
    %cst_9 = arith.constant 0.000000e+00 : f32
    %18 = vector.broadcast %cst_9 : f32 to vector<1x16xf32>
    %19 = arith.maximumf %17, %18 : vector<1x16xf32>
    %20 = vector.broadcast %10 : vector<1x16xf32> to vector<32x16xf32>
    %21 = arith.subf %6, %20 : vector<32x16xf32>
    %cst_10 = arith.constant 9.99999974E-6 : f32
    %22 = vector.broadcast %cst_10 : f32 to vector<1x16xf32>
    %23 = arith.addf %19, %22 : vector<1x16xf32>
    %24 = math.rsqrt %23 : vector<1x16xf32>
    %25 = vector.broadcast %24 : vector<1x16xf32> to vector<32x16xf32>
    %26 = arith.mulf %21, %25 : vector<32x16xf32>
    %c1 = arith.constant 1 : index
    %c0_11 = arith.constant 0 : index
    %27 = vector.load %arg4[%c1, %c0_11] : memref<25x256xf32, #tpu.memory_space<vmem>>, vector<1x16xf32>
    %28 = vector.broadcast %27 : vector<1x16xf32> to vector<32x16xf32>
    %29 = arith.mulf %26, %28 : vector<32x16xf32>
    %c2 = arith.constant 2 : index
    %c0_12 = arith.constant 0 : index
    %30 = vector.load %arg4[%c2, %c0_12] : memref<25x256xf32, #tpu.memory_space<vmem>>, vector<1x16xf32>
    %31 = vector.broadcast %30 : vector<1x16xf32> to vector<32x16xf32>
    %32 = arith.addf %29, %31 : vector<32x16xf32>
    %cst_13 = arith.constant 0.000000e+00 : f32
    %33 = vector.broadcast %cst_13 : f32 to vector<32x16xf32>
    %34 = arith.cmpf ogt, %32, %33 : vector<32x16xf32>
    %cst_14 = arith.constant 2.000000e-01 : f32
    %35 = vector.broadcast %cst_14 : f32 to vector<32x16xf32>
    %36 = arith.mulf %35, %32 : vector<32x16xf32>
    %37 = arith.select %34, %32, %36 : vector<32x16xi1>, vector<32x16xf32>
    %c0_15 = arith.constant 0 : index
    %c0_16 = arith.constant 0 : index
    %38 = vector.load %arg3[%c0_15, %c0_16] : memref<32x16xf32, #tpu.memory_space<vmem>>, vector<32x16xf32>
    %39 = tpu.concatenate %37, %38 in 1 : vector<32x16xf32>, vector<32x16xf32> -> vector<32x32xf32>
    %c0_17 = arith.constant 0 : index
    %c0_18 = arith.constant 0 : index
    %40 = vector.load %arg8[%c0_17, %c0_18] : memref<32x32xf32, #tpu.memory_space<vmem>>, vector<32x32xf32>
    tpu.vector_store %arg8[%c0_17, %c0_18], %39 {strides = array<i32>} : memref<32x32xf32, #tpu.memory_space<vmem>>, vector<32x32xf32>,
    %c0_19 = arith.constant 0 : index
    %c0_20 = arith.constant 0 : index
    %41 = tpu.strided_load %arg8[%c0_19, %c0_20] {strides = array<i32: 2, 1>} : memref<32x32xf32, #tpu.memory_space<vmem>>, vector<16x32xf32>
    %c1_21 = arith.constant 1 : index
    %c0_22 = arith.constant 0 : index
    %42 = tpu.strided_load %arg8[%c1_21, %c0_22] {strides = array<i32: 2, 1>} : memref<32x32xf32, #tpu.memory_space<vmem>>, vector<16x32xf32>
    %c128 = arith.constant 128 : index
    %c0_23 = arith.constant 0 : index
    %43 = vector.load %arg5[%c128, %c0_23] : memref<576x128xbf16, #tpu.memory_space<vmem>>, vector<32x48xbf16>
    %44 = arith.truncf %41 : vector<16x32xf32> to vector<16x32xbf16>
    %cst_24 = arith.constant dense<0.000000e+00> : vector<16x48xf32>
    %45 = tpu.matmul %44, %43, %cst_24 {dimension_numbers = #tpu.dot_dimension_numbers<[1], [0], [0], [1], [0, 0, 1, 1], [], []>} : vector<16x32xbf16>, vector<32x48xbf16>, vector<16x48xf32> -> vector<16x48xf32>
    %c160 = arith.constant 160 : index
    %c0_25 = arith.constant 0 : index
    %46 = vector.load %arg5[%c160, %c0_25] : memref<576x128xbf16, #tpu.memory_space<vmem>>, vector<32x48xbf16>
    %47 = arith.truncf %42 : vector<16x32xf32> to vector<16x32xbf16>
    %cst_26 = arith.constant dense<0.000000e+00> : vector<16x48xf32>
    %48 = tpu.matmul %47, %46, %cst_26 {dimension_numbers = #tpu.dot_dimension_numbers<[1], [0], [0], [1], [0, 0, 1, 1], [], []>} : vector<16x32xbf16>, vector<32x48xbf16>, vector<16x48xf32> -> vector<16x48xf32>
    %49 = arith.addf %45, %48 : vector<16x48xf32>
    %c3 = arith.constant 3 : index
    %c0_27 = arith.constant 0 : index
    %50 = vector.load %arg4[%c3, %c0_27] : memref<25x256xf32, #tpu.memory_space<vmem>>, vector<1x48xf32>
    %51 = vector.broadcast %50 : vector<1x48xf32> to vector<16x48xf32>
    %52 = arith.addf %49, %51 : vector<16x48xf32>
    %cst_28 = arith.constant dense<0.000000e+00> : vector<48xf32>
    %53 = vector.multi_reduction <add>, %52, %cst_28 [0] : vector<16x48xf32> to vector<48xf32>
    %54 = vector.shape_cast %53 : vector<48xf32> to vector<1x48xf32>
    %cst_29 = arith.constant 1.600000e+01 : f32
    %55 = vector.broadcast %cst_29 : f32 to vector<1x48xf32>
    %56 = arith.divf %54, %55 : vector<1x48xf32>
    %57 = arith.mulf %52, %52 : vector<16x48xf32>
    %cst_30 = arith.constant dense<0.000000e+00> : vector<48xf32>
    %58 = vector.multi_reduction <add>, %57, %cst_30 [0] : vector<16x48xf32> to vector<48xf32>
    %59 = vector.shape_cast %58 : vector<48xf32> to vector<1x48xf32>
    %cst_31 = arith.constant 1.600000e+01 : f32
    %60 = vector.broadcast %cst_31 : f32 to vector<1x48xf32>
    %61 = arith.divf %59, %60 : vector<1x48xf32>
    %62 = arith.mulf %56, %56 : vector<1x48xf32>
    %63 = arith.subf %61, %62 : vector<1x48xf32>
    %cst_32 = arith.constant 0.000000e+00 : f32
    %64 = vector.broadcast %cst_32 : f32 to vector<1x48xf32>
    %65 = arith.maximumf %63, %64 : vector<1x48xf32>
    %66 = vector.broadcast %56 : vector<1x48xf32> to vector<16x48xf32>
    %67 = arith.subf %52, %66 : vector<16x48xf32>
    %cst_33 = arith.constant 9.99999974E-6 : f32
    %68 = vector.broadcast %cst_33 : f32 to vector<1x48xf32>
    %69 = arith.addf %65, %68 : vector<1x48xf32>
    %70 = math.rsqrt %69 : vector<1x48xf32>
    %71 = vector.broadcast %70 : vector<1x48xf32> to vector<16x48xf32>
    %72 = arith.mulf %67, %71 : vector<16x48xf32>
    %c4 = arith.constant 4 : index
    %c0_34 = arith.constant 0 : index
    %73 = vector.load %arg4[%c4, %c0_34] : memref<25x256xf32, #tpu.memory_space<vmem>>, vector<1x48xf32>
    %74 = vector.broadcast %73 : vector<1x48xf32> to vector<16x48xf32>
    %75 = arith.mulf %72, %74 : vector<16x48xf32>
    %c5 = arith.constant 5 : index
    %c0_35 = arith.constant 0 : index
    %76 = vector.load %arg4[%c5, %c0_35] : memref<25x256xf32, #tpu.memory_space<vmem>>, vector<1x48xf32>
    %77 = vector.broadcast %76 : vector<1x48xf32> to vector<16x48xf32>
    %78 = arith.addf %75, %77 : vector<16x48xf32>
    %cst_36 = arith.constant 0.000000e+00 : f32
    %79 = vector.broadcast %cst_36 : f32 to vector<16x48xf32>
    %80 = arith.cmpf ogt, %78, %79 : vector<16x48xf32>
    %cst_37 = arith.constant 2.000000e-01 : f32
    %81 = vector.broadcast %cst_37 : f32 to vector<16x48xf32>
    %82 = arith.mulf %81, %78 : vector<16x48xf32>
    %83 = arith.select %80, %78, %82 : vector<16x48xi1>, vector<16x48xf32>
    %c0_38 = arith.constant 0 : index
    %c0_39 = arith.constant 0 : index
    %84 = vector.load %arg9[%c0_38, %c0_39] : memref<16x48xf32, #tpu.memory_space<vmem>>, vector<16x48xf32>
    tpu.vector_store %arg9[%c0_38, %c0_39], %83 {strides = array<i32>} : memref<16x48xf32, #tpu.memory_space<vmem>>, vector<16x48xf32>,
    %c0_40 = arith.constant 0 : index
    %c0_41 = arith.constant 0 : index
    %85 = tpu.strided_load %arg9[%c0_40, %c0_41] {strides = array<i32: 2, 1>} : memref<16x48xf32, #tpu.memory_space<vmem>>, vector<8x48xf32>
    %c1_42 = arith.constant 1 : index
    %c0_43 = arith.constant 0 : index
    %86 = tpu.strided_load %arg9[%c1_42, %c0_43] {strides = array<i32: 2, 1>} : memref<16x48xf32, #tpu.memory_space<vmem>>, vector<8x48xf32>
    %c192 = arith.constant 192 : index
    %c0_44 = arith.constant 0 : index
    %87 = vector.load %arg5[%c192, %c0_44] : memref<576x128xbf16, #tpu.memory_space<vmem>>, vector<48x64xbf16>
    %88 = arith.truncf %85 : vector<8x48xf32> to vector<8x48xbf16>
    %cst_45 = arith.constant dense<0.000000e+00> : vector<8x64xf32>
    %89 = tpu.matmul %88, %87, %cst_45 {dimension_numbers = #tpu.dot_dimension_numbers<[1], [0], [0], [1], [0, 0, 1, 1], [], []>} : vector<8x48xbf16>, vector<48x64xbf16>, vector<8x64xf32> -> vector<8x64xf32>
    %c240 = arith.constant 240 : index
    %c0_46 = arith.constant 0 : index
    %90 = vector.load %arg5[%c240, %c0_46] : memref<576x128xbf16, #tpu.memory_space<vmem>>, vector<48x64xbf16>
    %91 = arith.truncf %86 : vector<8x48xf32> to vector<8x48xbf16>
    %cst_47 = arith.constant dense<0.000000e+00> : vector<8x64xf32>
    %92 = tpu.matmul %91, %90, %cst_47 {dimension_numbers = #tpu.dot_dimension_numbers<[1], [0], [0], [1], [0, 0, 1, 1], [], []>} : vector<8x48xbf16>, vector<48x64xbf16>, vector<8x64xf32> -> vector<8x64xf32>
    %93 = arith.addf %89, %92 : vector<8x64xf32>
    %c6 = arith.constant 6 : index
    %c0_48 = arith.constant 0 : index
    %94 = vector.load %arg4[%c6, %c0_48] : memref<25x256xf32, #tpu.memory_space<vmem>>, vector<1x64xf32>
    %95 = vector.broadcast %94 : vector<1x64xf32> to vector<8x64xf32>
    %96 = arith.addf %93, %95 : vector<8x64xf32>
    %cst_49 = arith.constant dense<0.000000e+00> : vector<64xf32>
    %97 = vector.multi_reduction <add>, %96, %cst_49 [0] : vector<8x64xf32> to vector<64xf32>
    %98 = vector.shape_cast %97 : vector<64xf32> to vector<1x64xf32>
    %cst_50 = arith.constant 8.000000e+00 : f32
    %99 = vector.broadcast %cst_50 : f32 to vector<1x64xf32>
    %100 = arith.divf %98, %99 : vector<1x64xf32>
    %101 = arith.mulf %96, %96 : vector<8x64xf32>
    %cst_51 = arith.constant dense<0.000000e+00> : vector<64xf32>
    %102 = vector.multi_reduction <add>, %101, %cst_51 [0] : vector<8x64xf32> to vector<64xf32>
    %103 = vector.shape_cast %102 : vector<64xf32> to vector<1x64xf32>
    %cst_52 = arith.constant 8.000000e+00 : f32
    %104 = vector.broadcast %cst_52 : f32 to vector<1x64xf32>
    %105 = arith.divf %103, %104 : vector<1x64xf32>
    %106 = arith.mulf %100, %100 : vector<1x64xf32>
    %107 = arith.subf %105, %106 : vector<1x64xf32>
    %cst_53 = arith.constant 0.000000e+00 : f32
    %108 = vector.broadcast %cst_53 : f32 to vector<1x64xf32>
    %109 = arith.maximumf %107, %108 : vector<1x64xf32>
    %110 = vector.broadcast %100 : vector<1x64xf32> to vector<8x64xf32>
    %111 = arith.subf %96, %110 : vector<8x64xf32>
    %cst_54 = arith.constant 9.99999974E-6 : f32
    %112 = vector.broadcast %cst_54 : f32 to vector<1x64xf32>
    %113 = arith.addf %109, %112 : vector<1x64xf32>
    %114 = math.rsqrt %113 : vector<1x64xf32>
    %115 = vector.broadcast %114 : vector<1x64xf32> to vector<8x64xf32>
    %116 = arith.mulf %111, %115 : vector<8x64xf32>
    %c7 = arith.constant 7 : index
    %c0_55 = arith.constant 0 : index
    %117 = vector.load %arg4[%c7, %c0_55] : memref<25x256xf32, #tpu.memory_space<vmem>>, vector<1x64xf32>
    %118 = vector.broadcast %117 : vector<1x64xf32> to vector<8x64xf32>
    %119 = arith.mulf %116, %118 : vector<8x64xf32>
    %c8 = arith.constant 8 : index
    %c0_56 = arith.constant 0 : index
    %120 = vector.load %arg4[%c8, %c0_56] : memref<25x256xf32, #tpu.memory_space<vmem>>, vector<1x64xf32>
    %121 = vector.broadcast %120 : vector<1x64xf32> to vector<8x64xf32>
    %122 = arith.addf %119, %121 : vector<8x64xf32>
    %cst_57 = arith.constant 0.000000e+00 : f32
    %123 = vector.broadcast %cst_57 : f32 to vector<8x64xf32>
    %124 = arith.cmpf ogt, %122, %123 : vector<8x64xf32>
    %cst_58 = arith.constant 2.000000e-01 : f32
    %125 = vector.broadcast %cst_58 : f32 to vector<8x64xf32>
    %126 = arith.mulf %125, %122 : vector<8x64xf32>
    %127 = arith.select %124, %122, %126 : vector<8x64xi1>, vector<8x64xf32>
    %c0_59 = arith.constant 0 : index
    %c0_60 = arith.constant 0 : index
    %128 = vector.load %arg10[%c0_59, %c0_60] : memref<8x64xf32, #tpu.memory_space<vmem>>, vector<8x64xf32>
    tpu.vector_store %arg10[%c0_59, %c0_60], %127 {strides = array<i32>} : memref<8x64xf32, #tpu.memory_space<vmem>>, vector<8x64xf32>,
    %c0_61 = arith.constant 0 : index
    %c0_62 = arith.constant 0 : index
    %129 = tpu.strided_load %arg10[%c0_61, %c0_62] {strides = array<i32: 2, 1>} : memref<8x64xf32, #tpu.memory_space<vmem>>, vector<4x64xf32>
    %c1_63 = arith.constant 1 : index
    %c0_64 = arith.constant 0 : index
    %130 = tpu.strided_load %arg10[%c1_63, %c0_64] {strides = array<i32: 2, 1>} : memref<8x64xf32, #tpu.memory_space<vmem>>, vector<4x64xf32>
    %c288 = arith.constant 288 : index
    %c0_65 = arith.constant 0 : index
    %131 = vector.load %arg5[%c288, %c0_65] : memref<576x128xbf16, #tpu.memory_space<vmem>>, vector<64x128xbf16>
    %132 = arith.truncf %129 : vector<4x64xf32> to vector<4x64xbf16>
    %cst_66 = arith.constant dense<0.000000e+00> : vector<4x128xf32>
    %133 = tpu.matmul %132, %131, %cst_66 {dimension_numbers = #tpu.dot_dimension_numbers<[1], [0], [0], [1], [0, 0, 1, 1], [], []>} : vector<4x64xbf16>, vector<64x128xbf16>, vector<4x128xf32> -> vector<4x128xf32>
    %c352 = arith.constant 352 : index
    %c0_67 = arith.constant 0 : index
    %134 = vector.load %arg5[%c352, %c0_67] : memref<576x128xbf16, #tpu.memory_space<vmem>>, vector<64x128xbf16>
    %135 = arith.truncf %130 : vector<4x64xf32> to vector<4x64xbf16>
    %cst_68 = arith.constant dense<0.000000e+00> : vector<4x128xf32>
    %136 = tpu.matmul %135, %134, %cst_68 {dimension_numbers = #tpu.dot_dimension_numbers<[1], [0], [0], [1], [0, 0, 1, 1], [], []>} : vector<4x64xbf16>, vector<64x128xbf16>, vector<4x128xf32> -> vector<4x128xf32>
    %137 = arith.addf %133, %136 : vector<4x128xf32>
    %c9 = arith.constant 9 : index
    %c0_69 = arith.constant 0 : index
    %138 = vector.load %arg4[%c9, %c0_69] : memref<25x256xf32, #tpu.memory_space<vmem>>, vector<1x128xf32>
    %139 = vector.broadcast %138 : vector<1x128xf32> to vector<4x128xf32>
    %140 = arith.addf %137, %139 : vector<4x128xf32>
    %cst_70 = arith.constant dense<0.000000e+00> : vector<128xf32>
    %141 = vector.multi_reduction <add>, %140, %cst_70 [0] : vector<4x128xf32> to vector<128xf32>
    %142 = vector.shape_cast %141 : vector<128xf32> to vector<1x128xf32>
    %cst_71 = arith.constant 4.000000e+00 : f32
    %143 = vector.broadcast %cst_71 : f32 to vector<1x128xf32>
    %144 = arith.divf %142, %143 : vector<1x128xf32>
    %145 = arith.mulf %140, %140 : vector<4x128xf32>
    %cst_72 = arith.constant dense<0.000000e+00> : vector<128xf32>
    %146 = vector.multi_reduction <add>, %145, %cst_72 [0] : vector<4x128xf32> to vector<128xf32>
    %147 = vector.shape_cast %146 : vector<128xf32> to vector<1x128xf32>
    %cst_73 = arith.constant 4.000000e+00 : f32
    %148 = vector.broadcast %cst_73 : f32 to vector<1x128xf32>
    %149 = arith.divf %147, %148 : vector<1x128xf32>
    %150 = arith.mulf %144, %144 : vector<1x128xf32>
    %151 = arith.subf %149, %150 : vector<1x128xf32>
    %cst_74 = arith.constant 0.000000e+00 : f32
    %152 = vector.broadcast %cst_74 : f32 to vector<1x128xf32>
    %153 = arith.maximumf %151, %152 : vector<1x128xf32>
    %154 = vector.broadcast %144 : vector<1x128xf32> to vector<4x128xf32>
    %155 = arith.subf %140, %154 : vector<4x128xf32>
    %cst_75 = arith.constant 9.99999974E-6 : f32
    %156 = vector.broadcast %cst_75 : f32 to vector<1x128xf32>
    %157 = arith.addf %153, %156 : vector<1x128xf32>
    %158 = math.rsqrt %157 : vector<1x128xf32>
    %159 = vector.broadcast %158 : vector<1x128xf32> to vector<4x128xf32>
    %160 = arith.mulf %155, %159 : vector<4x128xf32>
    %c10 = arith.constant 10 : index
    %c0_76 = arith.constant 0 : index
    %161 = vector.load %arg4[%c10, %c0_76] : memref<25x256xf32, #tpu.memory_space<vmem>>, vector<1x128xf32>
    %162 = vector.broadcast %161 : vector<1x128xf32> to vector<4x128xf32>
    %163 = arith.mulf %160, %162 : vector<4x128xf32>
    %c11 = arith.constant 11 : index
    %c0_77 = arith.constant 0 : index
    %164 = vector.load %arg4[%c11, %c0_77] : memref<25x256xf32, #tpu.memory_space<vmem>>, vector<1x128xf32>
    %165 = vector.broadcast %164 : vector<1x128xf32> to vector<4x128xf32>
    %166 = arith.addf %163, %165 : vector<4x128xf32>
    %cst_78 = arith.constant 0.000000e+00 : f32
    %167 = vector.broadcast %cst_78 : f32 to vector<4x128xf32>
    %168 = arith.cmpf ogt, %166, %167 : vector<4x128xf32>
    %cst_79 = arith.constant 2.000000e-01 : f32
    %169 = vector.broadcast %cst_79 : f32 to vector<4x128xf32>
    %170 = arith.mulf %169, %166 : vector<4x128xf32>
    %171 = arith.select %168, %166, %170 : vector<4x128xi1>, vector<4x128xf32>
    %c0_80 = arith.constant 0 : index
    %c0_81 = arith.constant 0 : index
    %172 = vector.load %arg1[%c0_80, %c0_81] : memref<2x100xf32, #tpu.memory_space<vmem>>, vector<2x100xf32>
    %c0_82 = arith.constant 0 : index
    %c0_83 = arith.constant 0 : index
    %173 = vector.load %arg6[%c0_82, %c0_83] : memref<736x256xbf16, #tpu.memory_space<vmem>>, vector<100x256xbf16>
    %174 = arith.truncf %172 : vector<2x100xf32> to vector<2x100xbf16>
    %cst_84 = arith.constant dense<0.000000e+00> : vector<2x256xf32>
    %175 = tpu.matmul %174, %173, %cst_84 {dimension_numbers = #tpu.dot_dimension_numbers<[1], [0], [0], [1], [0, 0, 1, 1], [], []>} : vector<2x100xbf16>, vector<100x256xbf16>, vector<2x256xf32> -> vector<2x256xf32>
    %c12 = arith.constant 12 : index
    %c0_85 = arith.constant 0 : index
    %176 = vector.load %arg4[%c12, %c0_85] : memref<25x256xf32, #tpu.memory_space<vmem>>, vector<1x256xf32>
    %177 = vector.broadcast %176 : vector<1x256xf32> to vector<2x256xf32>
    %178 = arith.addf %175, %177 : vector<2x256xf32>
    %cst_86 = arith.constant dense<0.000000e+00> : vector<256xf32>
    %179 = vector.multi_reduction <add>, %178, %cst_86 [0] : vector<2x256xf32> to vector<256xf32>
    %180 = vector.shape_cast %179 : vector<256xf32> to vector<1x256xf32>
    %cst_87 = arith.constant 2.000000e+00 : f32
    %181 = vector.broadcast %cst_87 : f32 to vector<1x256xf32>
    %182 = arith.divf %180, %181 : vector<1x256xf32>
    %183 = arith.mulf %178, %178 : vector<2x256xf32>
    %cst_88 = arith.constant dense<0.000000e+00> : vector<256xf32>
    %184 = vector.multi_reduction <add>, %183, %cst_88 [0] : vector<2x256xf32> to vector<256xf32>
    %185 = vector.shape_cast %184 : vector<256xf32> to vector<1x256xf32>
    %cst_89 = arith.constant 2.000000e+00 : f32
    %186 = vector.broadcast %cst_89 : f32 to vector<1x256xf32>
    %187 = arith.divf %185, %186 : vector<1x256xf32>
    %188 = arith.mulf %182, %182 : vector<1x256xf32>
    %189 = arith.subf %187, %188 : vector<1x256xf32>
    %cst_90 = arith.constant 0.000000e+00 : f32
    %190 = vector.broadcast %cst_90 : f32 to vector<1x256xf32>
    %191 = arith.maximumf %189, %190 : vector<1x256xf32>
    %192 = vector.broadcast %182 : vector<1x256xf32> to vector<2x256xf32>
    %193 = arith.subf %178, %192 : vector<2x256xf32>
    %cst_91 = arith.constant 9.99999974E-6 : f32
    %194 = vector.broadcast %cst_91 : f32 to vector<1x256xf32>
    %195 = arith.addf %191, %194 : vector<1x256xf32>
    %196 = math.rsqrt %195 : vector<1x256xf32>
    %197 = vector.broadcast %196 : vector<1x256xf32> to vector<2x256xf32>
    %198 = arith.mulf %193, %197 : vector<2x256xf32>
    %c13 = arith.constant 13 : index
    %c0_92 = arith.constant 0 : index
    %199 = vector.load %arg4[%c13, %c0_92] : memref<25x256xf32, #tpu.memory_space<vmem>>, vector<1x256xf32>
    %200 = vector.broadcast %199 : vector<1x256xf32> to vector<2x256xf32>
    %201 = arith.mulf %198, %200 : vector<2x256xf32>
    %c14 = arith.constant 14 : index
    %c0_93 = arith.constant 0 : index
    %202 = vector.load %arg4[%c14, %c0_93] : memref<25x256xf32, #tpu.memory_space<vmem>>, vector<1x256xf32>
    %203 = vector.broadcast %202 : vector<1x256xf32> to vector<2x256xf32>
    %204 = arith.addf %201, %203 : vector<2x256xf32>
    %cst_94 = arith.constant 0.000000e+00 : f32
    %205 = vector.broadcast %cst_94 : f32 to vector<2x256xf32>
    %206 = arith.cmpf ogt, %204, %205 : vector<2x256xf32>
    %cst_95 = arith.constant 2.000000e-01 : f32
    %207 = vector.broadcast %cst_95 : f32 to vector<2x256xf32>
    %208 = arith.mulf %207, %204 : vector<2x256xf32>
    %209 = arith.select %206, %204, %208 : vector<2x256xi1>, vector<2x256xf32>
    %210 = vector.extract_strided_slice %209 {offsets = [0, 0], sizes = [2, 128], strides = [1, 1]} : vector<2x256xf32> to vector<2x128xf32>
    %c0_96 = arith.constant 0 : index
    %c0_97 = arith.constant 0 : index
    %211 = tpu.strided_load %arg11[%c0_96, %c0_97] {strides = array<i32: 2, 1>} : memref<4x128xf32, #tpu.memory_space<vmem>>, vector<2x128xf32>
    tpu.strided_store %arg11[%c0_96, %c0_97], %210 {strides = array<i32: 2, 1>} : memref<4x128xf32, #tpu.memory_space<vmem>>, vector<2x128xf32>
    %212 = vector.extract_strided_slice %209 {offsets = [0, 128], sizes = [2, 128], strides = [1, 1]} : vector<2x256xf32> to vector<2x128xf32>
    %c1_98 = arith.constant 1 : index
    %c0_99 = arith.constant 0 : index
    %213 = tpu.strided_load %arg11[%c1_98, %c0_99] {strides = array<i32: 2, 1>} : memref<4x128xf32, #tpu.memory_space<vmem>>, vector<2x128xf32>
    tpu.strided_store %arg11[%c1_98, %c0_99], %212 {strides = array<i32: 2, 1>} : memref<4x128xf32, #tpu.memory_space<vmem>>, vector<2x128xf32>
    %c0_100 = arith.constant 0 : index
    %c0_101 = arith.constant 0 : index
    %214 = vector.load %arg11[%c0_100, %c0_101] : memref<4x128xf32, #tpu.memory_space<vmem>>, vector<4x128xf32>
    %215 = arith.truncf %214 : vector<4x128xf32> to vector<4x128xbf16>
    %216 = arith.truncf %171 : vector<4x128xf32> to vector<4x128xbf16>
    %217 = tpu.concatenate %215, %216 in 1 : vector<4x128xbf16>, vector<4x128xbf16> -> vector<4x256xbf16>
    %c112 = arith.constant 112 : index
    %c0_102 = arith.constant 0 : index
    %218 = vector.load %arg6[%c112, %c0_102] : memref<736x256xbf16, #tpu.memory_space<vmem>>, vector<256x256xbf16>
    %cst_103 = arith.constant dense<0.000000e+00> : vector<4x256xf32>
    %219 = tpu.matmul %217, %218, %cst_103 {dimension_numbers = #tpu.dot_dimension_numbers<[1], [0], [0], [1], [0, 0, 1, 1], [], []>} : vector<4x256xbf16>, vector<256x256xbf16>, vector<4x256xf32> -> vector<4x256xf32>
    %220 = vector.extract_strided_slice %219 {offsets = [0, 0], sizes = [4, 128], strides = [1, 1]} : vector<4x256xf32> to vector<4x128xf32>
    %c0_104 = arith.constant 0 : index
    %c0_105 = arith.constant 0 : index
    %221 = tpu.strided_load %arg12[%c0_104, %c0_105] {strides = array<i32: 2, 1>} : memref<8x128xf32, #tpu.memory_space<vmem>>, vector<4x128xf32>
    tpu.strided_store %arg12[%c0_104, %c0_105], %220 {strides = array<i32: 2, 1>} : memref<8x128xf32, #tpu.memory_space<vmem>>, vector<4x128xf32>
    %222 = vector.extract_strided_slice %219 {offsets = [0, 128], sizes = [4, 128], strides = [1, 1]} : vector<4x256xf32> to vector<4x128xf32>
    %c1_106 = arith.constant 1 : index
    %c0_107 = arith.constant 0 : index
    %223 = tpu.strided_load %arg12[%c1_106, %c0_107] {strides = array<i32: 2, 1>} : memref<8x128xf32, #tpu.memory_space<vmem>>, vector<4x128xf32>
    tpu.strided_store %arg12[%c1_106, %c0_107], %222 {strides = array<i32: 2, 1>} : memref<8x128xf32, #tpu.memory_space<vmem>>, vector<4x128xf32>
    %c0_108 = arith.constant 0 : index
    %c0_109 = arith.constant 0 : index
    %224 = vector.load %arg12[%c0_108, %c0_109] : memref<8x128xf32, #tpu.memory_space<vmem>>, vector<8x128xf32>
    %c15 = arith.constant 15 : index
    %c0_110 = arith.constant 0 : index
    %225 = vector.load %arg4[%c15, %c0_110] : memref<25x256xf32, #tpu.memory_space<vmem>>, vector<1x128xf32>
    %226 = vector.broadcast %225 : vector<1x128xf32> to vector<8x128xf32>
    %227 = arith.addf %224, %226 : vector<8x128xf32>
    %cst_111 = arith.constant dense<0.000000e+00> : vector<128xf32>
    %228 = vector.multi_reduction <add>, %227, %cst_111 [0] : vector<8x128xf32> to vector<128xf32>
    %229 = vector.shape_cast %228 : vector<128xf32> to vector<1x128xf32>
    %cst_112 = arith.constant 8.000000e+00 : f32
    %230 = vector.broadcast %cst_112 : f32 to vector<1x128xf32>
    %231 = arith.divf %229, %230 : vector<1x128xf32>
    %232 = arith.mulf %227, %227 : vector<8x128xf32>
    %cst_113 = arith.constant dense<0.000000e+00> : vector<128xf32>
    %233 = vector.multi_reduction <add>, %232, %cst_113 [0] : vector<8x128xf32> to vector<128xf32>
    %234 = vector.shape_cast %233 : vector<128xf32> to vector<1x128xf32>
    %cst_114 = arith.constant 8.000000e+00 : f32
    %235 = vector.broadcast %cst_114 : f32 to vector<1x128xf32>
    %236 = arith.divf %234, %235 : vector<1x128xf32>
    %237 = arith.mulf %231, %231 : vector<1x128xf32>
    %238 = arith.subf %236, %237 : vector<1x128xf32>
    %cst_115 = arith.constant 0.000000e+00 : f32
    %239 = vector.broadcast %cst_115 : f32 to vector<1x128xf32>
    %240 = arith.maximumf %238, %239 : vector<1x128xf32>
    %241 = vector.broadcast %231 : vector<1x128xf32> to vector<8x128xf32>
    %242 = arith.subf %227, %241 : vector<8x128xf32>
    %cst_116 = arith.constant 9.99999974E-6 : f32
    %243 = vector.broadcast %cst_116 : f32 to vector<1x128xf32>
    %244 = arith.addf %240, %243 : vector<1x128xf32>
    %245 = math.rsqrt %244 : vector<1x128xf32>
    %246 = vector.broadcast %245 : vector<1x128xf32> to vector<8x128xf32>
    %247 = arith.mulf %242, %246 : vector<8x128xf32>
    %c16 = arith.constant 16 : index
    %c0_117 = arith.constant 0 : index
    %248 = vector.load %arg4[%c16, %c0_117] : memref<25x256xf32, #tpu.memory_space<vmem>>, vector<1x128xf32>
    %249 = vector.broadcast %248 : vector<1x128xf32> to vector<8x128xf32>
    %250 = arith.mulf %247, %249 : vector<8x128xf32>
    %c17 = arith.constant 17 : index
    %c0_118 = arith.constant 0 : index
    %251 = vector.load %arg4[%c17, %c0_118] : memref<25x256xf32, #tpu.memory_space<vmem>>, vector<1x128xf32>
    %252 = vector.broadcast %251 : vector<1x128xf32> to vector<8x128xf32>
    %253 = arith.addf %250, %252 : vector<8x128xf32>
    %cst_119 = arith.constant 0.000000e+00 : f32
    %254 = vector.broadcast %cst_119 : f32 to vector<8x128xf32>
    %255 = arith.cmpf ogt, %253, %254 : vector<8x128xf32>
    %cst_120 = arith.constant 2.000000e-01 : f32
    %256 = vector.broadcast %cst_120 : f32 to vector<8x128xf32>
    %257 = arith.mulf %256, %253 : vector<8x128xf32>
    %258 = arith.select %255, %253, %257 : vector<8x128xi1>, vector<8x128xf32>
    %c0_121 = arith.constant 0 : index
    %c0_122 = arith.constant 0 : index
    %259 = vector.load %arg10[%c0_121, %c0_122] : memref<8x64xf32, #tpu.memory_space<vmem>>, vector<8x64xf32>
    %260 = arith.truncf %258 : vector<8x128xf32> to vector<8x128xbf16>
    %261 = arith.truncf %259 : vector<8x64xf32> to vector<8x64xbf16>
    %262 = tpu.concatenate %260, %261 in 1 : vector<8x128xbf16>, vector<8x64xbf16> -> vector<8x192xbf16>
    %c368 = arith.constant 368 : index
    %c0_123 = arith.constant 0 : index
    %263 = vector.load %arg6[%c368, %c0_123] : memref<736x256xbf16, #tpu.memory_space<vmem>>, vector<192x256xbf16>
    %cst_124 = arith.constant dense<0.000000e+00> : vector<8x256xf32>
    %264 = tpu.matmul %262, %263, %cst_124 {dimension_numbers = #tpu.dot_dimension_numbers<[1], [0], [0], [1], [0, 0, 1, 1], [], []>} : vector<8x192xbf16>, vector<192x256xbf16>, vector<8x256xf32> -> vector<8x256xf32>
    %265 = vector.extract_strided_slice %264 {offsets = [0, 0], sizes = [8, 128], strides = [1, 1]} : vector<8x256xf32> to vector<8x128xf32>
    %c0_125 = arith.constant 0 : index
    %c0_126 = arith.constant 0 : index
    %266 = tpu.strided_load %arg13[%c0_125, %c0_126] {strides = array<i32: 2, 1>} : memref<16x128xf32, #tpu.memory_space<vmem>>, vector<8x128xf32>
    tpu.strided_store %arg13[%c0_125, %c0_126], %265 {strides = array<i32: 2, 1>} : memref<16x128xf32, #tpu.memory_space<vmem>>, vector<8x128xf32>
    %267 = vector.extract_strided_slice %264 {offsets = [0, 128], sizes = [8, 128], strides = [1, 1]} : vector<8x256xf32> to vector<8x128xf32>
    %c1_127 = arith.constant 1 : index
    %c0_128 = arith.constant 0 : index
    %268 = tpu.strided_load %arg13[%c1_127, %c0_128] {strides = array<i32: 2, 1>} : memref<16x128xf32, #tpu.memory_space<vmem>>, vector<8x128xf32>
    tpu.strided_store %arg13[%c1_127, %c0_128], %267 {strides = array<i32: 2, 1>} : memref<16x128xf32, #tpu.memory_space<vmem>>, vector<8x128xf32>
    %c0_129 = arith.constant 0 : index
    %c0_130 = arith.constant 0 : index
    %269 = vector.load %arg13[%c0_129, %c0_130] : memref<16x128xf32, #tpu.memory_space<vmem>>, vector<16x128xf32>
    %c18 = arith.constant 18 : index
    %c0_131 = arith.constant 0 : index
    %270 = vector.load %arg4[%c18, %c0_131] : memref<25x256xf32, #tpu.memory_space<vmem>>, vector<1x128xf32>
    %271 = vector.broadcast %270 : vector<1x128xf32> to vector<16x128xf32>
    %272 = arith.addf %269, %271 : vector<16x128xf32>
    %cst_132 = arith.constant dense<0.000000e+00> : vector<128xf32>
    %273 = vector.multi_reduction <add>, %272, %cst_132 [0] : vector<16x128xf32> to vector<128xf32>
    %274 = vector.shape_cast %273 : vector<128xf32> to vector<1x128xf32>
    %cst_133 = arith.constant 1.600000e+01 : f32
    %275 = vector.broadcast %cst_133 : f32 to vector<1x128xf32>
    %276 = arith.divf %274, %275 : vector<1x128xf32>
    %277 = arith.mulf %272, %272 : vector<16x128xf32>
    %cst_134 = arith.constant dense<0.000000e+00> : vector<128xf32>
    %278 = vector.multi_reduction <add>, %277, %cst_134 [0] : vector<16x128xf32> to vector<128xf32>
    %279 = vector.shape_cast %278 : vector<128xf32> to vector<1x128xf32>
    %cst_135 = arith.constant 1.600000e+01 : f32
    %280 = vector.broadcast %cst_135 : f32 to vector<1x128xf32>
    %281 = arith.divf %279, %280 : vector<1x128xf32>
    %282 = arith.mulf %276, %276 : vector<1x128xf32>
    %283 = arith.subf %281, %282 : vector<1x128xf32>
    %cst_136 = arith.constant 0.000000e+00 : f32
    %284 = vector.broadcast %cst_136 : f32 to vector<1x128xf32>
    %285 = arith.maximumf %283, %284 : vector<1x128xf32>
    %286 = vector.broadcast %276 : vector<1x128xf32> to vector<16x128xf32>
    %287 = arith.subf %272, %286 : vector<16x128xf32>
    %cst_137 = arith.constant 9.99999974E-6 : f32
    %288 = vector.broadcast %cst_137 : f32 to vector<1x128xf32>
    %289 = arith.addf %285, %288 : vector<1x128xf32>
    %290 = math.rsqrt %289 : vector<1x128xf32>
    %291 = vector.broadcast %290 : vector<1x128xf32> to vector<16x128xf32>
    %292 = arith.mulf %287, %291 : vector<16x128xf32>
    %c19 = arith.constant 19 : index
    %c0_138 = arith.constant 0 : index
    %293 = vector.load %arg4[%c19, %c0_138] : memref<25x256xf32, #tpu.memory_space<vmem>>, vector<1x128xf32>
    %294 = vector.broadcast %293 : vector<1x128xf32> to vector<16x128xf32>
    %295 = arith.mulf %292, %294 : vector<16x128xf32>
    %c20 = arith.constant 20 : index
    %c0_139 = arith.constant 0 : index
    %296 = vector.load %arg4[%c20, %c0_139] : memref<25x256xf32, #tpu.memory_space<vmem>>, vector<1x128xf32>
    %297 = vector.broadcast %296 : vector<1x128xf32> to vector<16x128xf32>
    %298 = arith.addf %295, %297 : vector<16x128xf32>
    %cst_140 = arith.constant 0.000000e+00 : f32
    %299 = vector.broadcast %cst_140 : f32 to vector<16x128xf32>
    %300 = arith.cmpf ogt, %298, %299 : vector<16x128xf32>
    %cst_141 = arith.constant 2.000000e-01 : f32
    %301 = vector.broadcast %cst_141 : f32 to vector<16x128xf32>
    %302 = arith.mulf %301, %298 : vector<16x128xf32>
    %303 = arith.select %300, %298, %302 : vector<16x128xi1>, vector<16x128xf32>
    %c0_142 = arith.constant 0 : index
    %c0_143 = arith.constant 0 : index
    %304 = vector.load %arg9[%c0_142, %c0_143] : memref<16x48xf32, #tpu.memory_space<vmem>>, vector<16x48xf32>
    %305 = arith.truncf %303 : vector<16x128xf32> to vector<16x128xbf16>
    %306 = arith.truncf %304 : vector<16x48xf32> to vector<16x48xbf16>
    %307 = tpu.concatenate %305, %306 in 1 : vector<16x128xbf16>, vector<16x48xbf16> -> vector<16x176xbf16>
    %c560 = arith.constant 560 : index
    %c0_144 = arith.constant 0 : index
    %308 = vector.load %arg6[%c560, %c0_144] : memref<736x256xbf16, #tpu.memory_space<vmem>>, vector<176x256xbf16>
    %cst_145 = arith.constant dense<0.000000e+00> : vector<16x256xf32>
    %309 = tpu.matmul %307, %308, %cst_145 {dimension_numbers = #tpu.dot_dimension_numbers<[1], [0], [0], [1], [0, 0, 1, 1], [], []>} : vector<16x176xbf16>, vector<176x256xbf16>, vector<16x256xf32> -> vector<16x256xf32>
    %310 = vector.extract_strided_slice %309 {offsets = [0, 0], sizes = [16, 128], strides = [1, 1]} : vector<16x256xf32> to vector<16x128xf32>
    %c0_146 = arith.constant 0 : index
    %c0_147 = arith.constant 0 : index
    %311 = tpu.strided_load %arg14[%c0_146, %c0_147] {strides = array<i32: 2, 1>} : memref<32x128xf32, #tpu.memory_space<vmem>>, vector<16x128xf32>
    tpu.strided_store %arg14[%c0_146, %c0_147], %310 {strides = array<i32: 2, 1>} : memref<32x128xf32, #tpu.memory_space<vmem>>, vector<16x128xf32>
    %312 = vector.extract_strided_slice %309 {offsets = [0, 128], sizes = [16, 128], strides = [1, 1]} : vector<16x256xf32> to vector<16x128xf32>
    %c1_148 = arith.constant 1 : index
    %c0_149 = arith.constant 0 : index
    %313 = tpu.strided_load %arg14[%c1_148, %c0_149] {strides = array<i32: 2, 1>} : memref<32x128xf32, #tpu.memory_space<vmem>>, vector<16x128xf32>
    tpu.strided_store %arg14[%c1_148, %c0_149], %312 {strides = array<i32: 2, 1>} : memref<32x128xf32, #tpu.memory_space<vmem>>, vector<16x128xf32>
    %c0_150 = arith.constant 0 : index
    %c0_151 = arith.constant 0 : index
    %314 = vector.load %arg14[%c0_150, %c0_151] : memref<32x128xf32, #tpu.memory_space<vmem>>, vector<32x128xf32>
    %c21 = arith.constant 21 : index
    %c0_152 = arith.constant 0 : index
    %315 = vector.load %arg4[%c21, %c0_152] : memref<25x256xf32, #tpu.memory_space<vmem>>, vector<1x128xf32>
    %316 = vector.broadcast %315 : vector<1x128xf32> to vector<32x128xf32>
    %317 = arith.addf %314, %316 : vector<32x128xf32>
    %cst_153 = arith.constant dense<0.000000e+00> : vector<128xf32>
    %318 = vector.multi_reduction <add>, %317, %cst_153 [0] : vector<32x128xf32> to vector<128xf32>
    %319 = vector.shape_cast %318 : vector<128xf32> to vector<1x128xf32>
    %cst_154 = arith.constant 3.200000e+01 : f32
    %320 = vector.broadcast %cst_154 : f32 to vector<1x128xf32>
    %321 = arith.divf %319, %320 : vector<1x128xf32>
    %322 = arith.mulf %317, %317 : vector<32x128xf32>
    %cst_155 = arith.constant dense<0.000000e+00> : vector<128xf32>
    %323 = vector.multi_reduction <add>, %322, %cst_155 [0] : vector<32x128xf32> to vector<128xf32>
    %324 = vector.shape_cast %323 : vector<128xf32> to vector<1x128xf32>
    %cst_156 = arith.constant 3.200000e+01 : f32
    %325 = vector.broadcast %cst_156 : f32 to vector<1x128xf32>
    %326 = arith.divf %324, %325 : vector<1x128xf32>
    %327 = arith.mulf %321, %321 : vector<1x128xf32>
    %328 = arith.subf %326, %327 : vector<1x128xf32>
    %cst_157 = arith.constant 0.000000e+00 : f32
    %329 = vector.broadcast %cst_157 : f32 to vector<1x128xf32>
    %330 = arith.maximumf %328, %329 : vector<1x128xf32>
    %331 = vector.broadcast %321 : vector<1x128xf32> to vector<32x128xf32>
    %332 = arith.subf %317, %331 : vector<32x128xf32>
    %cst_158 = arith.constant 9.99999974E-6 : f32
    %333 = vector.broadcast %cst_158 : f32 to vector<1x128xf32>
    %334 = arith.addf %330, %333 : vector<1x128xf32>
    %335 = math.rsqrt %334 : vector<1x128xf32>
    %336 = vector.broadcast %335 : vector<1x128xf32> to vector<32x128xf32>
    %337 = arith.mulf %332, %336 : vector<32x128xf32>
    %c22 = arith.constant 22 : index
    %c0_159 = arith.constant 0 : index
    %338 = vector.load %arg4[%c22, %c0_159] : memref<25x256xf32, #tpu.memory_space<vmem>>, vector<1x128xf32>
    %339 = vector.broadcast %338 : vector<1x128xf32> to vector<32x128xf32>
    %340 = arith.mulf %337, %339 : vector<32x128xf32>
    %c23 = arith.constant 23 : index
    %c0_160 = arith.constant 0 : index
    %341 = vector.load %arg4[%c23, %c0_160] : memref<25x256xf32, #tpu.memory_space<vmem>>, vector<1x128xf32>
    %342 = vector.broadcast %341 : vector<1x128xf32> to vector<32x128xf32>
    %343 = arith.addf %340, %342 : vector<32x128xf32>
    %cst_161 = arith.constant 0.000000e+00 : f32
    %344 = vector.broadcast %cst_161 : f32 to vector<32x128xf32>
    %345 = arith.cmpf ogt, %343, %344 : vector<32x128xf32>
    %cst_162 = arith.constant 2.000000e-01 : f32
    %346 = vector.broadcast %cst_162 : f32 to vector<32x128xf32>
    %347 = arith.mulf %346, %343 : vector<32x128xf32>
    %348 = arith.select %345, %343, %347 : vector<32x128xi1>, vector<32x128xf32>
    %349 = arith.truncf %348 : vector<32x128xf32> to vector<32x128xbf16>
    %c0_163 = arith.constant 0 : index
    %c0_164 = arith.constant 0 : index
    %350 = vector.load %arg8[%c0_163, %c0_164] : memref<32x32xf32, #tpu.memory_space<vmem>>, vector<32x32xf32>
    %351 = arith.truncf %350 : vector<32x32xf32> to vector<32x32xbf16>
    %352 = tpu.concatenate %349, %351 in 1 : vector<32x128xbf16>, vector<32x32xbf16> -> vector<32x160xbf16>
    %c416 = arith.constant 416 : index
    %c0_165 = arith.constant 0 : index
    %353 = vector.load %arg5[%c416, %c0_165] : memref<576x128xbf16, #tpu.memory_space<vmem>>, vector<160x128xbf16>
    %cst_166 = arith.constant dense<0.000000e+00> : vector<32x128xf32>
    %354 = tpu.matmul %352, %353, %cst_166 {dimension_numbers = #tpu.dot_dimension_numbers<[1], [0], [0], [1], [0, 0, 1, 1], [], []>} : vector<32x160xbf16>, vector<160x128xbf16>, vector<32x128xf32> -> vector<32x128xf32>
    %c24 = arith.constant 24 : index
    %c0_167 = arith.constant 0 : index
    %355 = vector.load %arg4[%c24, %c0_167] : memref<25x256xf32, #tpu.memory_space<vmem>>, vector<1x128xf32>
    %356 = vector.broadcast %355 : vector<1x128xf32> to vector<32x128xf32>
    %357 = arith.addf %354, %356 : vector<32x128xf32>
    %358 = arith.negf %357 : vector<32x128xf32>
    %359 = math.exp %358 : vector<32x128xf32>
    %cst_168 = arith.constant 1.000000e+00 : f32
    %360 = vector.broadcast %cst_168 : f32 to vector<32x128xf32>
    %361 = arith.addf %360, %359 : vector<32x128xf32>
    %362 = arith.divf %360, %361 : vector<32x128xf32>
    %c0_169 = arith.constant 0 : index
    %c0_170 = arith.constant 0 : index
    %363 = vector.load %arg7[%c0_169, %c0_170] : memref<32x128xf32, #tpu.memory_space<vmem>>, vector<32x128xf32>
    tpu.vector_store %arg7[%c0_169, %c0_170], %362 {strides = array<i32>} : memref<32x128xf32, #tpu.memory_space<vmem>>, vector<32x128xf32>,
    return
  }
  func.func @transform_0(%arg0: i32) -> (i32, i32) {
    %c0_i32 = arith.constant 0 : i32
    %c0_i32_0 = arith.constant 0 : i32
    %c0_i32_1 = arith.constant 0 : i32
    return %c0_i32, %c0_i32_0 : i32, i32
  }
  func.func @transform_1(%arg0: i32) -> (i32, i32) {
    %c0_i32 = arith.constant 0 : i32
    %c0_i32_0 = arith.constant 0 : i32
    %c0_i32_1 = arith.constant 0 : i32
    return %c0_i32, %c0_i32_0 : i32, i32
  }
  func.func @transform_2(%arg0: i32) -> (i32, i32) {
    %c0_i32 = arith.constant 0 : i32
    %c0_i32_0 = arith.constant 0 : i32
    %c0_i32_1 = arith.constant 0 : i32
    return %c0_i32, %c0_i32_0 : i32, i32
  }
  func.func @transform_3(%arg0: i32) -> (i32, i32) {
    %c0_i32 = arith.constant 0 : i32
    %c0_i32_0 = arith.constant 0 : i32
    %c0_i32_1 = arith.constant 0 : i32
    return %c0_i32, %c0_i32_0 : i32, i32
  }
  func.func @transform_4(%arg0: i32) -> (i32, i32) {
    %c0_i32 = arith.constant 0 : i32
    %c0_i32_0 = arith.constant 0 : i32
    %c0_i32_1 = arith.constant 0 : i32
    return %c0_i32, %c0_i32_0 : i32, i32
  }
  func.func @transform_5(%arg0: i32) -> (i32, i32) {
    %c0_i32 = arith.constant 0 : i32
    %c0_i32_0 = arith.constant 0 : i32
    %c0_i32_1 = arith.constant 0 : i32
    return %c0_i32, %c0_i32_0 : i32, i32
  }
  func.func @transform_6(%arg0: i32) -> (i32, i32) {
    %c0_i32 = arith.constant 0 : i32
    %c0_i32_0 = arith.constant 0 : i32
    %c0_i32_1 = arith.constant 0 : i32
    return %c0_i32, %c0_i32_0 : i32, i32
  }
}

</mosaic_0001>

<bundles_post_ra>
// kernel: forward.1
= control target key start
LH: loop header
LB: loop body
LE: loop exit
PB: predicated region body
PF: predicated region fallthrough
CT: control target
= control target key end

     0   :  { %11 = vsyncpa [#allocation10], 0  ;;  %s3088_s0 = inlined_call_operand.vmem [shape: f32[2,100], index: 0, kind: input, shape index: {}]   ;;  %s3089_s1 = inlined_call_operand.hbm [shape: f32[32,128], index: 1, kind: input, shape index: {}]   ;;  %s3090_s2 = inlined_call_operand.vmem [shape: f32[32,16], index: 2, kind: input, shape index: {}]   ;;  %s3091_s3 = inlined_call_operand.hbm [shape: f32[25,256], index: 3, kind: input, shape index: {}]   ;;  %s3092_s4 = inlined_call_operand.hbm [shape: bf16[576,128], index: 4, kind: input, shape index: {}]   ;;  %s3093_s5 = inlined_call_operand.vmem [shape: bf16[736,256], index: 5, kind: input, shape index: {}]   ;;  %s3094_s6 = inlined_call_operand.hbm [shape: f32[32,128], index: 6, kind: output, shape index: {}]  }
   0x1   :  { %12 = vsyncpa [#allocation13], 0 }
   0x2   :  { %13 = vsyncpa [#allocation11], 0  ;;  %s2589_s21 = smov [#allocation12]   ;;  %s2495_s25 = scalar_lea.hbm %s3091_s3, 1024 }
   0x3   :  { %s35_s22 = sshll.u32 %s2589_s21, 4  ;;  %p2496_p0 = scmp.ne.s32.totalorder %s3091_s3, %s2495_s25  ;;  %s36_s22 = int_to_ptr.vmem [resolvable:$true] %s35_s22 }
   0x4   :  { %p2499_p1 = scmp.lt.u32.totalorder %s2495_s25, %s3091_s3 }
   0x6   :  { %p2501_p2 = pnand %p2499_p1, %p2496_p0 }
   0x8   :  { %2504 = shalt.err (!%p2501_p2)
}
   0x9   :  { %s2505_s30 = scalar_lea.vmem %s36_s22, 1024  ;;  %p2510_p4 = scmp.lt.s32.totalorder %s36_s22, %s36_s22 }
   0xa   :  { %p2506_p3 = scmp.ne.s32.totalorder %s36_s22, %s2505_s30  ;;  %p2511_p5 = scmp.lt.s32.totalorder %s2505_s30, %s2505_s30 }
   0xc   :  { %p2512_p6 = por %p2511_p5, %p2510_p4 }
   0xe   :  { %p2513_p7 = pnand %p2512_p6, %p2506_p3 }
  0x10   :  { %2516 = shalt.err (!%p2513_p7)
}
  0x11   :  { %s2590_s7 = smov 256   ;;  %s2591_s8 = smov 16  }
  0x12   :  { %41 = dma.hbm_to_vmem [thread:$0]  %s3091_s3, 1024, %s36_s22, [#allocation13], %s2590_s7, %s2590_s7, %s2591_s8  }
  0x13   :  { %s2592_s11 = smov [#allocation9]   ;;  %s2517_s15 = scalar_lea.hbm %s3089_s1, 512 }
  0x14   :  { %s21_s12 = sshll.u32 %s2592_s11, 4  ;;  %p2518_p8 = scmp.ne.s32.totalorder %s3089_s1, %s2517_s15  ;;  %s22_s12 = int_to_ptr.vmem [resolvable:$true] %s21_s12 }
  0x15   :  { %p2521_p9 = scmp.lt.u32.totalorder %s2517_s15, %s3089_s1 }
  0x17   :  { %p2523_p10 = pnand %p2521_p9, %p2518_p8 }
  0x19   :  { %2526 = shalt.err (!%p2523_p10)
}
  0x1a   :  { %s2527_s20 = scalar_lea.vmem %s22_s12, 512  ;;  %p2532_p12 = scmp.lt.s32.totalorder %s22_s12, %s22_s12 }
  0x1b   :  { %p2528_p11 = scmp.ne.s32.totalorder %s22_s12, %s2527_s20  ;;  %p2533_p13 = scmp.lt.s32.totalorder %s2527_s20, %s2527_s20 }
  0x1d   :  { %p2534_p0 = por %p2533_p13, %p2532_p12 }
  0x1f   :  { %p2535_p1 = pnand %p2534_p0, %p2528_p11 }
  0x21   :  { %2538 = shalt.err (!%p2535_p1)
}
  0x22   :  { %s2593_s3 = smov 128   ;;  %s2594_s21 = smov 8  }
  0x23   :  { %27 = dma.hbm_to_vmem [thread:$0]  %s3089_s1, 512, %s22_s12, [#allocation10], %s2593_s3, %s2593_s3, %s2594_s21  }
  0x24   :  { %s2595_s24 = smov [#allocation14]   ;;  %s2539_s28 = scalar_lea.hbm %s3092_s4, 4608 }
  0x25   :  { %s47_s25 = sshll.u32 %s2595_s24, 4  ;;  %p2540_p2 = scmp.ne.s32.totalorder %s3092_s4, %s2539_s28  ;;  %s48_s25 = int_to_ptr.vmem [resolvable:$true] %s47_s25 }
  0x26   :  { %p2543_p3 = scmp.lt.u32.totalorder %s2539_s28, %s3092_s4 }
  0x28   :  { %p2545_p4 = pnand %p2543_p3, %p2540_p2 }
  0x2a   :  { %2548 = shalt.err (!%p2545_p4)
}
  0x2b   :  { %s2549_s10 = scalar_lea.vmem %s48_s25, 4608  ;;  %p2554_p6 = scmp.lt.s32.totalorder %s48_s25, %s48_s25 }
  0x2c   :  { %p2550_p5 = scmp.ne.s32.totalorder %s48_s25, %s2549_s10  ;;  %p2555_p7 = scmp.lt.s32.totalorder %s2549_s10, %s2549_s10 }
  0x2e   :  { %p2556_p8 = por %p2555_p7, %p2554_p6 }
  0x30   :  { %p2557_p9 = pnand %p2556_p8, %p2550_p5 }
  0x32   :  { %2560 = shalt.err (!%p2557_p9)
}
  0x33   :  { %s2596_s1 = smov 64   ;;  %s2597_s11 = smov 4  }
  0x34   :  { %53 = dma.hbm_to_vmem [thread:$0]  %s3092_s4, 4608, %s48_s25, [#allocation13], %s2596_s1, %s2596_s1, %s2597_s11  }
  0x35   :  { %2583 = dma.done.wait [#allocation10], 512  }
  0x36   :  { %2584 = vsyncadd [#allocation10], 4294966784 }
  0x37   :  { %2585 = dma.done.wait [#allocation13], 5632  }
  0x38   :  { %2586 = vsyncadd [#allocation13], 4294961664  ;;  %v2288_v0 = vld [vmem:[#allocation14] sm:$0xff]   ;;  %v2289_v1 = vld [vmem:[#allocation14 + $0x8] sm:$0xff]   ;;  %v2598_v19 = vmov 0.0   ;;  %vm2599_vm0 = vmmov 0  }
  0x39   :  { %2195 = vmatprep.subr.bf16.mxu0 %v2288_v0  ;;  %v2290_v2 = vld [vmem:[#allocation14 + $0x10] sm:$0xff]   ;;  %v2291_v3 = vld [vmem:[#allocation14 + $0x18] sm:$0xff]   ;;  %v66_v4 = vld [vmem:[#allocation9] sm:$0xff]  ;;  %2215 = vmatprep.subr.bf16.mxu1 %v2598_v19  ;;  %vm186_vm1 = vcmask 130048   ;;  %vm279_vm2 = vcmask 261120   ;;  %vm416_vm7 = vcmask 392192  }
  0x3a   :  { %2196 = vmatpush3.bf16.msra.mxu0 %v2288_v0  ;;  %v67_v5 = vld [vmem:[#allocation9 + $0x8] sm:$0xff]  ;;  %v257_v7 = vld [vmem:[%s3090_s2 + $0x10] sm:$0xff]  ;;  %v256_v11 = vld [vmem:[%s3090_s2 + $0x8] sm:$0xff]  ;;  %2219 = vmatprep.mubr.msk.bf16.mxu1 %vm2599_vm0, %v2598_v19  ;;  %vm604_vm10 = vcmask 523264   ;;  %vm925_vm12 = vcmask 1041408   ;;  %vm921_vm13 = vcmask 818176  }
  0x3b   :  { %2197 = vmatprep.subr.bf16.mxu0 %v2289_v1  ;;  %v86_v6 = vpack.c.bf16 %v67_v5, %v66_v4  ;;  %v255_v8 = vld [vmem:[%s3090_s2] sm:$0xff]  ;;  %v2292_v9 = vld [vmem:[#allocation14 + $0x20] sm:$0xff]   ;;  %267 = vrot.lane.b32.xlu1 %v257_v7, %s2591_s8  ;;  %v2295_v14 = vld [vmem:[#allocation14 + $0x38] sm:$0xff]   ;;  %vm795_vm14 = vcmask 1043456  }
  0x3c   :  { %263 = vrot.lane.b32.xlu0 %v255_v8, %s2591_s8  ;;  %v258_v10 = vld [vmem:[%s3090_s2 + $0x18] sm:$0xff]  ;;  %v2294_v13 = vld [vmem:[#allocation14 + $0x30] sm:$0xff]   ;;  %v69_v16 = vld [vmem:[#allocation9 + $0x18] sm:$0xff] }
  0x3d   :  { %2211 = vmatprep.mubr.bf16.mxu0 %v86_v6  ;;  %v2293_v12 = vld [vmem:[#allocation14 + $0x28] sm:$0xff]   ;;  %v68_v15 = vld [vmem:[#allocation9 + $0x10] sm:$0xff]  ;;  %v2297_v20 = vld [vmem:[#allocation14 + $0x58] sm:$0xff]  }
  0x3e   :  { %2198 = vmatpush3.bf16.msra.mxu0 %v2289_v1  ;;  %v87_v17 = vpack.c.bf16 %v69_v16, %v68_v15  ;;  %v2296_v18 = vld [vmem:[#allocation14 + $0x50] sm:$0xff]   ;;  %v88_v21 = vld [vmem:[#allocation12] ss:$0 sm:$0xff]  ;;  %v233_v7 = vld [vmem:[#allocation12 + $0x1] ss:$0 sm:$0xff] }
  0x3f   :  { %2199 = vmatprep.subr.bf16.mxu0 %v2290_v2  ;;  %269 = vrot.lane.b32.xlu1 %v258_v10, %s2591_s8 }
  0x40   :  { %265 = vrot.lane.b32.xlu0 %v256_v11, %s2591_s8  ;;  %2216 = vmatpush3.bf16.msra.mxu1 %v2296_v18 }
  0x41   :  { %2217 = vmatprep.subr.bf16.mxu1 %v2598_v19 }
  0x42   :  { %2200 = vmatpush3.bf16.msra.mxu0 %v2290_v2 }
  0x43   :  { %2201 = vmatprep.subr.bf16.mxu0 %v2291_v3 }
  0x44   :  { %2218 = vmatpush3.bf16.msra.mxu1 %v2297_v20 }
  0x45   :  { %2223 = vmatprep.subr.bf16.mxu1 %v2598_v19 }
  0x46   :  { %2202 = vmatpush3.bf16.msra.mxu0 %v2291_v3 }
  0x47   :  { %2203 = vmatprep.subr.bf16.mxu0 %v2292_v9 }
  0x4a   :  { %2204 = vmatpush3.bf16.msra.mxu0 %v2292_v9 }
  0x4b   :  { %2205 = vmatprep.subr.bf16.mxu0 %v2293_v12 }
  0x4e   :  { %2206 = vmatpush3.bf16.msra.mxu0 %v2293_v12 }
  0x4f   :  { %2207 = vmatprep.subr.bf16.mxu0 %v2294_v13 }
  0x52   :  { %2208 = vmatpush3.bf16.msra.mxu0 %v2294_v13  ;;  %v238_v13 = vld [vmem:[#allocation12 + $0x2] ss:$0 sm:$0xff] }
  0x53   :  { %2209 = vmatprep.subr.bf16.mxu0 %v2295_v14 }
  0x56   :  { %2210 = vmatpush3.bf16.msra.mxu0 %v2295_v14 }
  0x57   :  { %2251 = vmatprep.subr.bf16.mxu0 %v2598_v19 }
  0x59   :  { %2212 = vmatmul.mubr.bf16.vlgmr.msra.gmra.mrb[0].mxu0 %v87_v17 }
  0x5a   :  { %2259 = vmatprep.mubr.msk.bf16.mxu0 %vm2599_vm0, %v2598_v19 }
  0xad   :  { %v268_v12 = vpop.permute.xlu1 %267 }
  0xae   :  { %v264_v14 = vpop.permute.xlu0 %263 }
 0x12c   :  { %v2213_v22 = vpop.f32.mrb[0].mxu0 }
 0x12d   :  { %v171_v23 = vpop.f32.mrb[1].mxu0  ;;  %v180_v24 = vadd.f32 %v2213_v22, %v88_v21 }
 0x12e   :  { %v172_v25 = vadd.f32 %v171_v23, %v88_v21  ;;  %v2214_v26 = vpop.f32.mrb[2].mxu0 }
 0x12f   :  { %v174_v27 = vpop.f32.mrb[3].mxu0  ;;  %v183_v29 = vadd.f32 %v2214_v26, %v88_v21  ;;  %v204_v31 = vmul.f32 %v180_v24, %v180_v24  ;;  %v190_v36 = vsel %vm186_vm1, %v180_v24, 0.0  ;;  %v270_v26 = vpop.permute.xlu1 %269 }
 0x130   :  { %v202_v28 = vmul.f32 %v172_v25, %v172_v25  ;;  %v175_v30 = vadd.f32 %v174_v27, %v88_v21  ;;  %v187_v32 = vsel %vm186_vm1, %v172_v25, 0.0 }
 0x131   :  { %v205_v38 = vmul.f32 %v183_v29, %v183_v29  ;;  %v209_v42 = vsel %vm186_vm1, %v204_v31, 0.0  ;;  %v192_v43 = vsel %vm186_vm1, %v183_v29, 0.0 }
 0x132   :  { %v188_v33 = vsel %vm186_vm1, %v175_v30, 0.0  ;;  %v203_v34 = vmul.f32 %v175_v30, %v175_v30  ;;  %v206_v37 = vsel %vm186_vm1, %v202_v28, 0.0  ;;  %v266_v28 = vpop.permute.xlu0 %265 }
 0x133   :  { %v189_v35 = vadd.f32 %v188_v33, %v187_v32  ;;  %v211_v46 = vsel %vm186_vm1, %v205_v38, 0.0 }
 0x134   :  { %v207_v39 = vsel %vm186_vm1, %v203_v34, 0.0 }
 0x135   :  { %v191_v40 = vadd.f32 %v190_v36, %v189_v35  ;;  %v208_v41 = vadd.f32 %v207_v39, %v206_v37 }
 0x137   :  { %v193_v44 = vadd.f32 %v192_v43, %v191_v40  ;;  %v210_v45 = vadd.f32 %v209_v42, %v208_v41  ;;  %v2298_v40 = vld [vmem:[#allocation14 + $0x40] sm:$0xff]   ;;  %v2299_v42 = vld [vmem:[#allocation14 + $0x48] sm:$0xff]  }
 0x139   :  { %v194_v47 = vrot.slane %v193_v44, 4  ;;  %v212_v48 = vadd.f32 %v211_v46, %v210_v45  ;;  %v2300_v46 = vld [vmem:[#allocation14 + $0x78] sm:$0xff]  }
 0x13b   :  { %v195_v49 = vadd.f32 %v194_v47, %v193_v44  ;;  %v213_v50 = vrot.slane %v212_v48, 4  ;;  %v2301_v47 = vld [vmem:[#allocation14 + $0x80] sm:$0xff]  }
 0x13d   :  { %v196_v51 = vrot.slane %v195_v49, 2  ;;  %v214_v52 = vadd.f32 %v213_v50, %v212_v48  ;;  %v2302_v48 = vld [vmem:[#allocation14 + $0x88] sm:$0xff]  }
 0x13f   :  { %v197_v53 = vadd.f32 %v196_v51, %v195_v49  ;;  %v215_v54 = vrot.slane %v214_v52, 2 }
 0x141   :  { %v198_v55 = vrot.slane %v197_v53, 1  ;;  %v216_v56 = vadd.f32 %v215_v54, %v214_v52  ;;  %v413_v54 = vld [vmem:[#allocation12 + $0x3] ss:$0 sm:$0xff] }
 0x143   :  { %v199_v57 = vadd.f32 %v198_v55, %v197_v53  ;;  %v217_v58 = vrot.slane %v216_v56, 1 }
 0x145   :  { %v201_v59 = vmul.f32 0.03125, %v199_v57  ;;  %v218_v60 = vadd.f32 %v217_v58, %v216_v56 }
 0x147   :  { %v219_v61 = vmul.f32 0.03125, %v218_v60  ;;  %v220_v62 = vmul.f32 %v201_v59, %v201_v59  ;;  %v224_v63 = vsub.f32 %v175_v30, %v201_v59  ;;  %v225_v0 = vsub.f32 %v180_v24, %v201_v59 }
 0x148   :  { %v223_v1 = vsub.f32 %v172_v25, %v201_v59  ;;  %v226_v2 = vsub.f32 %v183_v29, %v201_v59 }
 0x149   :  { %v221_v3 = vsub.f32 %v219_v61, %v220_v62 }
 0x14b   :  { %v222_v4 = vmax.f32 %v221_v3, 0.0 }
 0x14d   :  { %v227_v5 = vadd.f32 1e-05, %v222_v4 }
 0x14f   :  { %2461 = vrsqrt.f32 %v227_v5 }
 0x159   :  { %v2462_v6 = vpop.eup %2461 }
 0x15a   :  { %v230_v8 = vmul.f32 %v2462_v6, %v224_v63  ;;  %v231_v9 = vmul.f32 %v2462_v6, %v225_v0  ;;  %v229_v10 = vmul.f32 %v2462_v6, %v223_v1  ;;  %v232_v11 = vmul.f32 %v2462_v6, %v226_v2 }
 0x15c   :  { %v235_v15 = vmul.f32 %v233_v7, %v230_v8  ;;  %v236_v16 = vmul.f32 %v233_v7, %v231_v9  ;;  %v234_v17 = vmul.f32 %v233_v7, %v229_v10  ;;  %v237_v18 = vmul.f32 %v233_v7, %v232_v11 }
 0x15e   :  { %v241_v20 = vadd.f32 %v238_v13, %v236_v16  ;;  %v239_v21 = vadd.f32 %v238_v13, %v234_v17  ;;  %v242_v22 = vadd.f32 %v238_v13, %v237_v18  ;;  %v240_v23 = vadd.f32 %v238_v13, %v235_v15 }
 0x160   :  { %vm245_vm3 = vcmp.gt.f32.partialorder %v241_v20, 0.0  ;;  %v249_v24 = vmul.f32 0.2, %v241_v20  ;;  %vm243_vm4 = vcmp.gt.f32.partialorder %v239_v21, 0.0  ;;  %v247_v25 = vmul.f32 0.2, %v239_v21 }
 0x161   :  { %vm246_vm5 = vcmp.gt.f32.partialorder %v242_v22, 0.0  ;;  %v250_v27 = vmul.f32 0.2, %v242_v22  ;;  %vm244_vm6 = vcmp.gt.f32.partialorder %v240_v23, 0.0  ;;  %v248_v29 = vmul.f32 0.2, %v240_v23 }
 0x162   :  { %v253_v30 = vsel %vm245_vm3, %v241_v20, %v249_v24  ;;  %v251_v31 = vsel %vm243_vm4, %v239_v21, %v247_v25 }
 0x163   :  { %v277_v32 = vsel %vm186_vm1, %v253_v30, %v268_v12  ;;  %v275_v33 = vsel %vm186_vm1, %v251_v31, %v264_v14  ;;  %v254_v34 = vsel %vm246_vm5, %v242_v22, %v250_v27  ;;  %v252_v35 = vsel %vm244_vm6, %v240_v23, %v248_v29  ;;  %v452_v31 = vld [vmem:[#allocation12 + $0x5] ss:$0 sm:$0xff] }
 0x164   :  { %282 = vst.msk [vmem:[#allocation2 + $0x10] sm:$0xff] %vm279_vm2, %v277_v32  ;;  %280 = vst.msk [vmem:[#allocation2] sm:$0xff] %vm279_vm2, %v275_v33  ;;  %v278_v36 = vsel %vm186_vm1, %v254_v34, %v270_v26  ;;  %v276_v37 = vsel %vm186_vm1, %v252_v35, %v266_v28  ;;  %v449_v28 = vld [vmem:[#allocation12 + $0x4] ss:$0 sm:$0xff] }
 0x165   :  { %283 = vst.msk [vmem:[#allocation2 + $0x18] sm:$0xff] %vm279_vm2, %v278_v36  ;;  %281 = vst.msk [vmem:[#allocation2 + $0x8] sm:$0xff] %vm279_vm2, %v276_v37 }
 0x16c   :  { %v288_v38 = vld [vmem:[#allocation2 + $0x1] ss:$2 sm:$0xff]  ;;  %v290_v39 = vld [vmem:[#allocation2 + $0x11] ss:$2 sm:$0xff]  ;;  %v284_v43 = vld [vmem:[#allocation2] ss:$2 sm:$0xff] }
 0x16d   :  { %v300_v41 = vpack.c.bf16 %v290_v39, %v288_v38  ;;  %v286_v44 = vld [vmem:[#allocation2 + $0x10] ss:$2 sm:$0xff] }
 0x16e   :  { %v295_v45 = vpack.c.bf16 %v286_v44, %v284_v43  ;;  %v2304_v43 = vld [vmem:[#allocation14 + $0x68] sm:$0xff]   ;;  %v2305_v44 = vld [vmem:[#allocation14 + $0x70] sm:$0xff]  }
 0x16f   :  { %2220 = vmatmul.mubr.msk.bf16.vlgmr.msra.gmra.mrb[0].mxu1 %vm279_vm2, %v300_v41  ;;  %v2303_v41 = vld [vmem:[#allocation14 + $0x60] sm:$0xff]  }
 0x170   :  { %2224 = vmatpush3.bf16.msra.mxu1 %v2298_v40  ;;  %2227 = vmatprep.mubr.msk.bf16.mxu1 %vm2599_vm0, %v2598_v19 }
 0x171   :  { %2225 = vmatprep.subr.bf16.mxu1 %v2598_v19 }
 0x174   :  { %2226 = vmatpush3.bf16.msra.mxu1 %v2299_v42 }
 0x175   :  { %2231 = vmatprep.subr.bf16.mxu1 %v2598_v19 }
 0x177   :  { %2228 = vmatmul.mubr.msk.bf16.vlgmr.msra.gmra.mrb[4].mxu1 %vm279_vm2, %v295_v45 }
 0x178   :  { %2237 = vmatprep.mubr.msk.bf16.mxu1 %vm2599_vm0, %v2598_v19  ;;  %2232 = vmatpush3.bf16.msra.mxu1 %v2300_v46 }
 0x179   :  { %2233 = vmatprep.subr.bf16.mxu1 %v2598_v19 }
 0x17c   :  { %2234 = vmatpush3.bf16.msra.mxu1 %v2301_v47  ;;  %v2306_v47 = vld [vmem:[#allocation14 + $0xb0] sm:$0xff]  }
 0x17d   :  { %2235 = vmatprep.subr.bf16.mxu1 %v2598_v19  ;;  %2252 = vmatpush3.bf16.msra.mxu0 %v2306_v47  ;;  %v2331_v47 = vld [vmem:[%s3093_s5 + $0x54] ss:$8 sps:$4 sm:$0xff]  }
 0x17e   :  { %2253 = vmatprep.subr.bf16.mxu0 %v2598_v19 }
 0x180   :  { %2236 = vmatpush3.bf16.msra.mxu1 %v2302_v48  ;;  %v2307_v48 = vld [vmem:[#allocation14 + $0x90] sm:$0xff]  }
 0x181   :  { %2241 = vmatprep.subr.bf16.mxu1 %v2598_v19 }
 0x242   :  { %v350_v49 = vpop.f32.mrb[0].mxu1 }
 0x243   :  { %v2221_v50 = vpop.f32.mrb[1].mxu1 }
 0x244   :  { %v353_v51 = vpop.f32.mrb[2].mxu1  ;;  %v2309_v50 = vld [vmem:[#allocation14 + $0x98] sm:$0xff]  }
 0x245   :  { %v2222_v52 = vpop.f32.mrb[3].mxu1 }
 0x246   :  { %v2311_v52 = vld [vmem:[#allocation14 + $0xa0] sm:$0xff]  }
 0x24a   :  { %v406_v53 = vpop.f32.mrb[4].mxu1 }
 0x24b   :  { %v407_v55 = vadd.f32 %v406_v53, %v350_v49  ;;  %v2229_v56 = vpop.f32.mrb[5].mxu1  ;;  %v2308_v49 = vld [vmem:[#allocation14 + $0xb8] sm:$0xff]   ;;  %v2312_v53 = vld [vmem:[#allocation14 + $0xc8] sm:$0xff]  }
 0x24c   :  { %v409_v57 = vpop.f32.mrb[6].mxu1  ;;  %2254 = vmatpush3.bf16.msra.mxu0 %v2308_v49  ;;  %v2329_v49 = vld [vmem:[%s3093_s5 + $0x50] ss:$8 sps:$4 sm:$0xff]  }
 0x24d   :  { %v414_v58 = vadd.f32 %v413_v54, %v407_v55  ;;  %v410_v59 = vadd.f32 %v409_v57, %v353_v51  ;;  %v2230_v60 = vpop.f32.mrb[7].mxu1  ;;  %2255 = vmatprep.subr.bf16.mxu0 %v2598_v19  ;;  %v2310_v51 = vld [vmem:[#allocation14 + $0xc0] sm:$0xff]   ;;  %v2316_v55 = vld [vmem:[%s3093_s5 + $0x4] ss:$8 sps:$4 sm:$0xff]  }
 0x24f   :  { %v428_v61 = vmul.f32 %v414_v58, %v414_v58  ;;  %v415_v62 = vadd.f32 %v413_v54, %v410_v59  ;;  %v417_v63 = vsel %vm416_vm7, %v414_v58, 0.0  ;;  %v2313_v54 = vld [vmem:[#allocation14 + $0xa8] sm:$0xff]  }
 0x250   :  { %2256 = vmatpush3.bf16.msra.mxu0 %v2310_v51 }
 0x251   :  { %v418_v0 = vsel %vm416_vm7, %v415_v62, 0.0  ;;  %v429_v1 = vmul.f32 %v415_v62, %v415_v62  ;;  %v430_v3 = vsel %vm416_vm7, %v428_v61, 0.0  ;;  %2257 = vmatprep.subr.bf16.mxu0 %v2598_v19  ;;  %v602_v61 = vld [vmem:[#allocation12 + $0x6] ss:$0 sm:$0xff] }
 0x252   :  { %v419_v2 = vadd.f32 %v418_v0, %v417_v63 }
 0x253   :  { %v431_v4 = vsel %vm416_vm7, %v429_v1, 0.0 }
 0x254   :  { %v420_v5 = vrot.slane %v419_v2, 4  ;;  %v432_v6 = vadd.f32 %v431_v4, %v430_v3  ;;  %2258 = vmatpush3.bf16.msra.mxu0 %v2312_v53 }
 0x255   :  { %932 = vmatprep.subr.bf16.mxu0 %v2316_v55 }
 0x256   :  { %v421_v7 = vadd.f32 %v420_v5, %v419_v2  ;;  %v433_v8 = vrot.slane %v432_v6, 4 }
 0x258   :  { %v422_v9 = vrot.slane %v421_v7, 2  ;;  %v434_v10 = vadd.f32 %v433_v8, %v432_v6 }
 0x25a   :  { %v423_v11 = vadd.f32 %v422_v9, %v421_v7  ;;  %v435_v12 = vrot.slane %v434_v10, 2 }
 0x25c   :  { %v424_v13 = vrot.slane %v423_v11, 1  ;;  %v436_v14 = vadd.f32 %v435_v12, %v434_v10 }
 0x25e   :  { %v425_v15 = vadd.f32 %v424_v13, %v423_v11  ;;  %v437_v16 = vrot.slane %v436_v14, 1 }
 0x260   :  { %v427_v17 = vmul.f32 0.0625, %v425_v15  ;;  %v438_v18 = vadd.f32 %v437_v16, %v436_v14 }
 0x262   :  { %v439_v20 = vmul.f32 0.0625, %v438_v18  ;;  %v440_v21 = vmul.f32 %v427_v17, %v427_v17  ;;  %v443_v22 = vsub.f32 %v414_v58, %v427_v17  ;;  %v444_v23 = vsub.f32 %v415_v62, %v427_v17 }
 0x264   :  { %v441_v24 = vsub.f32 %v439_v20, %v440_v21 }
 0x266   :  { %v442_v25 = vmax.f32 %v441_v24, 0.0 }
 0x268   :  { %v445_v26 = vadd.f32 1e-05, %v442_v25 }
 0x26a   :  { %2463 = vrsqrt.f32 %v445_v26  ;;  %v630_v26 = vld [vmem:[#allocation12 + $0x7] ss:$0 sm:$0xff] }
 0x274   :  { %v2464_v27 = vpop.eup %2463 }
 0x275   :  { %v447_v29 = vmul.f32 %v2464_v27, %v443_v22  ;;  %v448_v30 = vmul.f32 %v2464_v27, %v444_v23 }
 0x277   :  { %v450_v32 = vmul.f32 %v449_v28, %v447_v29  ;;  %v451_v33 = vmul.f32 %v449_v28, %v448_v30  ;;  %v632_v28 = vld [vmem:[#allocation12 + $0x10] ss:$0 sm:$0xff] }
 0x279   :  { %v453_v34 = vadd.f32 %v452_v31, %v450_v32  ;;  %v454_v35 = vadd.f32 %v452_v31, %v451_v33  ;;  %v2314_v33 = vld [vmem:[%s3093_s5] ss:$8 sps:$4 sm:$0xff]  }
 0x27b   :  { %vm455_vm8 = vcmp.gt.f32.partialorder %v453_v34, 0.0  ;;  %vm456_vm9 = vcmp.gt.f32.partialorder %v454_v35, 0.0  ;;  %v457_v36 = vmul.f32 0.2, %v453_v34  ;;  %v458_v37 = vmul.f32 0.2, %v454_v35 }
 0x27d   :  { %v459_v38 = vsel %vm455_vm8, %v453_v34, %v457_v36  ;;  %v460_v39 = vsel %vm456_vm9, %v454_v35, %v458_v37 }
 0x27e   :  { %461 = vst.msk [vmem:[#allocation3] sm:$0xff] %vm416_vm7, %v459_v38  ;;  %462 = vst.msk [vmem:[#allocation3 + $0x8] sm:$0xff] %vm416_vm7, %v460_v39  ;;  %v2319_v38 = vld [vmem:[%s3093_s5 + $0x14] ss:$8 sps:$4 sm:$0xff]   ;;  %v2317_v39 = vld [vmem:[%s3093_s5 + $0x10] ss:$8 sps:$4 sm:$0xff]  }
 0x285   :  { %v465_v40 = vld [vmem:[#allocation3 + $0x1] ss:$2 sm:$0xff]  ;;  %v463_v45 = vld [vmem:[#allocation3] ss:$2 sm:$0xff] }
 0x286   :  { %v479_v42 = vpack.c.bf16 %v465_v40, %v465_v40  ;;  %v472_v46 = vpack.c.bf16 %v463_v45, %v463_v45  ;;  %v2600_v40 = vmov 0   ;;  %v2328_v45 = vld [vmem:[%s3093_s5 + $0x44] ss:$8 sps:$4 sm:$0xff]  }
 0x288   :  { %2238 = vmatmul.mubr.msk.bf16.vlgmr.msra.gmra.mrb[8].mxu1 %vm416_vm7, %v479_v42  ;;  %v2320_v42 = vld [vmem:[%s3093_s5 + $0x20] ss:$8 sps:$4 sm:$0xff]  }
 0x289   :  { %2242 = vmatpush3.bf16.msra.mxu1 %v2303_v41  ;;  %2247 = vmatprep.mubr.msk.bf16.mxu1 %vm2599_vm0, %v2598_v19  ;;  %v2322_v41 = vld [vmem:[%s3093_s5 + $0x24] ss:$8 sps:$4 sm:$0xff]  }
 0x28a   :  { %2243 = vmatprep.subr.bf16.mxu1 %v2598_v19 }
 0x28d   :  { %2244 = vmatpush3.bf16.msra.mxu1 %v2304_v43  ;;  %v2325_v43 = vld [vmem:[%s3093_s5 + $0x34] ss:$8 sps:$4 sm:$0xff]  }
 0x28e   :  { %2245 = vmatprep.subr.bf16.mxu1 %v2598_v19 }
 0x291   :  { %2246 = vmatpush3.bf16.msra.mxu1 %v2305_v44  ;;  %v2323_v44 = vld [vmem:[%s3093_s5 + $0x30] ss:$8 sps:$4 sm:$0xff]  }
 0x292   :  { %2263 = vmatprep.subr.bf16.mxu1 %v2598_v19 }
 0x294   :  { %2248 = vmatmul.mubr.msk.bf16.vlgmr.msra.gmra.mrb[12].mxu1 %vm416_vm7, %v472_v46  ;;  %v2326_v46 = vld [vmem:[%s3093_s5 + $0x40] ss:$8 sps:$4 sm:$0xff]  }
 0x295   :  { %2271 = vmatprep.mubr.msk.bf16.mxu1 %vm2599_vm0, %v2598_v19  ;;  %2264 = vmatpush3.bf16.msra.mxu1 %v2307_v48  ;;  %v841_v48 = vld [vmem:[%s3093_s5 + $0x60] sm:$0x33] }
 0x296   :  { %2265 = vmatprep.subr.bf16.mxu1 %v2598_v19  ;;  %v2061_v51 = vcombine.low %v841_v48, %v841_v48 }
 0x298   :  { %v927_v53 = vsel %vm925_vm12, %v2061_v51, 0 }
 0x299   :  { %2266 = vmatpush3.bf16.msra.mxu1 %v2309_v50  ;;  %v2062_v50 = vcombine.high %v841_v48, %v841_v48 }
 0x29a   :  { %2267 = vmatprep.subr.bf16.mxu1 %v2598_v19 }
 0x29d   :  { %2268 = vmatpush3.bf16.msra.mxu1 %v2311_v52  ;;  %v828_v52 = vld [vmem:[%s3088_s0] sm:$0x3] }
 0x29e   :  { %2269 = vmatprep.subr.bf16.mxu1 %v2598_v19 }
 0x2a1   :  { %2270 = vmatpush3.bf16.msra.mxu1 %v2313_v54  ;;  %v842_v54 = vpack.c.bf16 %v828_v52, %v828_v52 }
 0x35b   :  { %v535_v56 = vpop.f32.mrb[8].mxu1 }
 0x35c   :  { %v2239_v57 = vpop.f32.mrb[9].mxu1 }
 0x35d   :  { %v538_v58 = vpop.f32.mrb[10].mxu1  ;;  %v2336_v57 = vld [vmem:[%s3093_s5 + $0x74] ss:$8 sps:$4 sm:$0xff]  }
 0x35e   :  { %v2240_v59 = vpop.f32.mrb[11].mxu1  ;;  %v2334_v58 = vld [vmem:[%s3093_s5 + $0x70] ss:$8 sps:$4 sm:$0xff]   ;;  %1256 = vmatprep.subr.bf16.mxu1 %v2336_v57 }
 0x35f   :  { %v2339_v59 = vld [vmem:[%s3093_s5 + $0x84] ss:$8 sps:$4 sm:$0xff]  }
 0x367   :  { %v596_v60 = vpop.f32.mrb[12].mxu1 }
 0x368   :  { %v597_v62 = vadd.f32 %v596_v60, %v535_v56  ;;  %v2249_v63 = vpop.f32.mrb[13].mxu1  ;;  %v2337_v60 = vld [vmem:[%s3093_s5 + $0x80] ss:$8 sps:$4 sm:$0xff]  }
 0x369   :  { %v599_v0 = vpop.f32.mrb[14].mxu1  ;;  %v2345_v63 = vld [vmem:[%s3093_s5 + $0xa4] ss:$8 sps:$4 sm:$0xff]  }
 0x36a   :  { %v603_v1 = vadd.f32 %v602_v61, %v597_v62  ;;  %v2250_v2 = vpop.f32.mrb[15].mxu1  ;;  %v2342_v61 = vld [vmem:[%s3093_s5 + $0x94] ss:$8 sps:$4 sm:$0xff]   ;;  %v2340_v62 = vld [vmem:[%s3093_s5 + $0x90] ss:$8 sps:$4 sm:$0xff]  }
 0x36b   :  { %v2343_v0 = vld [vmem:[%s3093_s5 + $0xa0] ss:$8 sps:$4 sm:$0xff]   ;;  %v2346_v2 = vld [vmem:[%s3093_s5 + $0xb0] ss:$8 sps:$4 sm:$0xff]  }
 0x36c   :  { %v605_v3 = vsel %vm604_vm10, %v603_v1, 0.0  ;;  %v614_v4 = vmul.f32 %v603_v1, %v603_v1 }
 0x36d   :  { %v606_v5 = vrot.slane %v605_v3, 4 }
 0x36e   :  { %v615_v19 = vsel %vm604_vm10, %v614_v4, 0.0  ;;  %v2349_v4 = vld [vmem:[%s3093_s5 + $0xc0] ss:$8 sps:$4 sm:$0xff]  }
 0x36f   :  { %v607_v6 = vadd.f32 %v606_v5, %v605_v3  ;;  %v616_v7 = vrot.slane %v615_v19, 4  ;;  %v2351_v3 = vld [vmem:[%s3093_s5 + $0xc4] ss:$8 sps:$4 sm:$0xff]   ;;  %v2354_v5 = vld [vmem:[%s3093_s5 + $0xd4] ss:$8 sps:$4 sm:$0xff]  }
 0x371   :  { %v608_v8 = vrot.slane %v607_v6, 2  ;;  %v617_v9 = vadd.f32 %v616_v7, %v615_v19  ;;  %v2352_v19 = vld [vmem:[%s3093_s5 + $0xd0] ss:$8 sps:$4 sm:$0xff]   ;;  %v2355_v7 = vld [vmem:[%s3093_s5 + $0xe0] ss:$8 sps:$4 sm:$0xff]  }
 0x373   :  { %v609_v10 = vadd.f32 %v608_v8, %v607_v6  ;;  %v618_v11 = vrot.slane %v617_v9, 2  ;;  %v2357_v6 = vld [vmem:[%s3093_s5 + $0xe4] ss:$8 sps:$4 sm:$0xff]   ;;  %v2360_v8 = vld [vmem:[%s3093_s5 + $0xf4] ss:$8 sps:$4 sm:$0xff]  }
 0x375   :  { %v610_v12 = vrot.slane %v609_v10, 1  ;;  %v619_v13 = vadd.f32 %v618_v11, %v617_v9  ;;  %v2358_v9 = vld [vmem:[%s3093_s5 + $0xf0] ss:$8 sps:$4 sm:$0xff]   ;;  %v2361_v11 = vld [vmem:[%s3093_s5 + $0x100] ss:$8 sps:$4 sm:$0xff]  }
 0x377   :  { %v611_v14 = vadd.f32 %v610_v12, %v609_v10  ;;  %v620_v15 = vrot.slane %v619_v13, 1  ;;  %v2363_v10 = vld [vmem:[%s3093_s5 + $0x104] ss:$8 sps:$4 sm:$0xff]   ;;  %v2366_v12 = vld [vmem:[%s3093_s5 + $0x114] ss:$8 sps:$4 sm:$0xff]  }
 0x379   :  { %v613_v16 = vmul.f32 0.125, %v611_v14  ;;  %v621_v17 = vadd.f32 %v620_v15, %v619_v13  ;;  %v2364_v13 = vld [vmem:[%s3093_s5 + $0x110] ss:$8 sps:$4 sm:$0xff]   ;;  %v2369_v14 = vld [vmem:[%s3093_s5 + $0x124] ss:$8 sps:$4 sm:$0xff]  }
 0x37a   :  { %v2367_v15 = vld [vmem:[%s3093_s5 + $0x120] ss:$8 sps:$4 sm:$0xff]  }
 0x37b   :  { %v622_v18 = vmul.f32 0.125, %v621_v17  ;;  %v623_v20 = vmul.f32 %v613_v16, %v613_v16  ;;  %v626_v24 = vsub.f32 %v603_v1, %v613_v16  ;;  %v2348_v1 = vld [vmem:[%s3093_s5 + $0xb4] ss:$8 sps:$4 sm:$0xff]   ;;  %v2370_v17 = vld [vmem:[%s3093_s5 + $0x130] ss:$8 sps:$4 sm:$0xff]  }
 0x37c   :  { %v2372_v16 = vld [vmem:[%s3093_s5 + $0x134] ss:$8 sps:$4 sm:$0xff]  }
 0x37d   :  { %v624_v21 = vsub.f32 %v622_v18, %v623_v20  ;;  %v2375_v18 = vld [vmem:[%s3093_s5 + $0x144] ss:$8 sps:$4 sm:$0xff]   ;;  %v2373_v20 = vld [vmem:[%s3093_s5 + $0x140] ss:$8 sps:$4 sm:$0xff]  }
 0x37f   :  { %v625_v22 = vmax.f32 %v624_v21, 0.0  ;;  %v2376_v21 = vld [vmem:[%s3093_s5 + $0x150] ss:$8 sps:$4 sm:$0xff]  }
 0x381   :  { %v627_v23 = vadd.f32 1e-05, %v625_v22  ;;  %v2378_v22 = vld [vmem:[%s3093_s5 + $0x154] ss:$8 sps:$4 sm:$0xff]  }
 0x383   :  { %2465 = vrsqrt.f32 %v627_v23  ;;  %v2381_v23 = vld [vmem:[%s3093_s5 + $0x164] ss:$8 sps:$4 sm:$0xff]  }
 0x38d   :  { %v2466_v25 = vpop.eup %2465 }
 0x38e   :  { %v629_v27 = vmul.f32 %v2466_v25, %v626_v24  ;;  %v2379_v24 = vld [vmem:[%s3093_s5 + $0x160] ss:$8 sps:$4 sm:$0xff]  }
 0x390   :  { %v631_v29 = vmul.f32 %v630_v26, %v629_v27  ;;  %v793_v27 = vld [vmem:[#allocation12 + $0x11] ss:$0 sm:$0xff] }
 0x392   :  { %v633_v30 = vadd.f32 %v632_v28, %v631_v29 }
 0x394   :  { %vm634_vm11 = vcmp.gt.f32.partialorder %v633_v30, 0.0  ;;  %v635_v31 = vmul.f32 0.2, %v633_v30 }
 0x396   :  { %v636_v32 = vsel %vm634_vm11, %v633_v30, %v635_v31 }
 0x397   :  { %637 = vst.msk [vmem:[#allocation4] sm:$0xff] %vm604_vm10, %v636_v32 }
 0x39e   :  { %v640_v34 = vld [vmem:[#allocation4 + $0x1] ss:$2 sm:$0xf]  ;;  %v638_v35 = vld [vmem:[#allocation4] ss:$2 sm:$0xf] }
 0x39f   :  { %v658_v36 = vpack.c.bf16 %v640_v34, %v640_v34  ;;  %v649_v37 = vpack.c.bf16 %v638_v35, %v638_v35  ;;  %v1332_v55 = vld [vmem:[#allocation4] sm:$0xff] }
 0x3a0   :  { %v1334_v56 = vpack.c.bf16 %v1332_v55, %v1332_v55 }
 0x3a1   :  { %2260 = vmatmul.mubr.msk.bf16.vlgmr.msra.gmra.mrb[4].mxu0 %vm604_vm10, %v658_v36  ;;  %2272 = vmatmul.mubr.msk.bf16.vlgmr.msra.gmra.mrb[16].mxu1 %vm604_vm10, %v649_v37 }
 0x3a2   :  { %933 = vmatpush1.bf16.msra.mxu0 %v2314_v33  ;;  %964 = vmatprep.mubr.bf16.mxu0 %v2600_v40 }
 0x3a3   :  { %934 = vmatprep.subr.bf16.mxu0 %v2319_v38  ;;  %1257 = vmatpush1.bf16.msra.mxu1 %v2334_v58 }
 0x3a4   :  { %1258 = vmatprep.subr.bf16.mxu1 %v2339_v59  ;;  %v844_v59 = vld [vmem:[#allocation12 + $0x14] ss:$8 sm:$0x3] }
 0x3a6   :  { %935 = vmatpush1.bf16.msra.mxu0 %v2317_v39 }
 0x3a7   :  { %936 = vmatprep.subr.bf16.mxu0 %v2322_v41  ;;  %1259 = vmatpush1.bf16.msra.mxu1 %v2337_v60 }
 0x3a8   :  { %1260 = vmatprep.subr.bf16.mxu1 %v2342_v61 }
 0x3aa   :  { %937 = vmatpush1.bf16.msra.mxu0 %v2320_v42 }
 0x3ab   :  { %938 = vmatprep.subr.bf16.mxu0 %v2325_v43  ;;  %1261 = vmatpush1.bf16.msra.mxu1 %v2340_v62 }
 0x3ac   :  { %1262 = vmatprep.subr.bf16.mxu1 %v2345_v63 }
 0x3ae   :  { %939 = vmatpush1.bf16.msra.mxu0 %v2323_v44 }
 0x3af   :  { %940 = vmatprep.subr.bf16.mxu0 %v2328_v45  ;;  %1263 = vmatpush1.bf16.msra.mxu1 %v2343_v0 }
 0x3b0   :  { %1264 = vmatprep.subr.bf16.mxu1 %v2348_v1 }
 0x3b2   :  { %941 = vmatpush1.bf16.msra.mxu0 %v2326_v46 }
 0x3b3   :  { %942 = vmatprep.subr.bf16.mxu0 %v2331_v47  ;;  %1265 = vmatpush1.bf16.msra.mxu1 %v2346_v2  ;;  %v846_v47 = vlaneseq }
 0x3b4   :  { %1266 = vmatprep.subr.bf16.mxu1 %v2351_v3 }
 0x3b5   :  { %v847_v52 = vshrl.u32 %v846_v47, 7 }
 0x3b6   :  { %943 = vmatpush1.bf16.msra.mxu0 %v2329_v49 }
 0x3b7   :  { %2063 = vmatprep.subr.msk.bf16.mxu0 %vm925_vm12, %v2062_v50  ;;  %1267 = vmatpush1.bf16.msra.mxu1 %v2349_v4  ;;  %v2896_v57 = vsub.s32 0, %v847_v52  ;;  %v2898_v60 = vsub.s32 1, %v847_v52 }
 0x3b8   :  { %1268 = vmatprep.subr.bf16.mxu1 %v2354_v5 }
 0x3b9   :  { %v849_v62 = vrot.slane %v844_v59, %v2896_v57  ;;  %v853_v0 = vrot.slane %v844_v59, %v2898_v60 }
 0x3ba   :  { %945 = vmatpush1.bf16.msra.mxu0 %v927_v53 }
 0x3bb   :  { %1269 = vmatpush1.bf16.msra.mxu1 %v2352_v19 }
 0x3bc   :  { %1270 = vmatprep.subr.bf16.mxu1 %v2357_v6 }
 0x3bd   :  { %2064 = vmatmul.mubr.msk.bf16.vlgmr.msra.gmra.mrb[8].mxu0 %vm921_vm13, %v842_v54 }
 0x3be   :  { %2121 = vmatprep.mubr.msk.bf16.mxu0 %vm604_vm10, %v1334_v56 }
 0x3bf   :  { %1271 = vmatpush1.bf16.msra.mxu1 %v2355_v7 }
 0x3c0   :  { %1272 = vmatprep.subr.bf16.mxu1 %v2360_v8 }
 0x3c3   :  { %1273 = vmatpush1.bf16.msra.mxu1 %v2358_v9 }
 0x3c4   :  { %1274 = vmatprep.subr.bf16.mxu1 %v2363_v10 }
 0x3c7   :  { %1275 = vmatpush1.bf16.msra.mxu1 %v2361_v11 }
 0x3c8   :  { %1276 = vmatprep.subr.bf16.mxu1 %v2366_v12 }
 0x3cb   :  { %1277 = vmatpush1.bf16.msra.mxu1 %v2364_v13 }
 0x3cc   :  { %1278 = vmatprep.subr.bf16.mxu1 %v2369_v14 }
 0x3cf   :  { %1279 = vmatpush1.bf16.msra.mxu1 %v2367_v15 }
 0x3d0   :  { %1280 = vmatprep.subr.bf16.mxu1 %v2372_v16 }
 0x3d3   :  { %1281 = vmatpush1.bf16.msra.mxu1 %v2370_v17 }
 0x3d4   :  { %1282 = vmatprep.subr.bf16.mxu1 %v2375_v18 }
 0x3d7   :  { %1283 = vmatpush1.bf16.msra.mxu1 %v2373_v20 }
 0x3d8   :  { %1284 = vmatprep.subr.bf16.mxu1 %v2378_v22 }
 0x3db   :  { %1285 = vmatpush1.bf16.msra.mxu1 %v2376_v21 }
 0x3dc   :  { %1286 = vmatprep.subr.bf16.mxu1 %v2381_v23 }
 0x3df   :  { %1287 = vmatpush1.bf16.msra.mxu1 %v2379_v24 }
 0x474   :  { %v720_v25 = vpop.f32.mrb[4].mxu0  ;;  %v787_v26 = vpop.f32.mrb[16].mxu1 }
 0x475   :  { %v788_v28 = vadd.f32 %v787_v26, %v720_v25  ;;  %v2261_v29 = vpop.f32.mrb[5].mxu0  ;;  %v2273_v30 = vpop.f32.mrb[17].mxu1 }
 0x476   :  { %v723_v31 = vpop.f32.mrb[6].mxu0  ;;  %v790_v32 = vpop.f32.mrb[18].mxu1 }
 0x477   :  { %v794_v33 = vadd.f32 %v793_v27, %v788_v28  ;;  %v2262_v34 = vpop.f32.mrb[7].mxu0  ;;  %v2274_v35 = vpop.f32.mrb[19].mxu1  ;;  %v821_v27 = vld [vmem:[#allocation12 + $0x12] ss:$0 sm:$0xff] }
 0x478   :  { %v823_v34 = vld [vmem:[#allocation12 + $0x13] ss:$0 sm:$0xff] }
 0x479   :  { %v796_v36 = vsel %vm795_vm14, %v794_v33, 0.0  ;;  %v805_v37 = vmul.f32 %v794_v33, %v794_v33 }
 0x47a   :  { %v797_v38 = vrot.slane %v796_v36, 4 }
 0x47b   :  { %v806_v39 = vsel %vm795_vm14, %v805_v37, 0.0 }
 0x47c   :  { %v798_v41 = vadd.f32 %v797_v38, %v796_v36  ;;  %v807_v42 = vrot.slane %v806_v39, 4 }
 0x47e   :  { %v799_v43 = vrot.slane %v798_v41, 2  ;;  %v808_v44 = vadd.f32 %v807_v42, %v806_v39 }
 0x480   :  { %v800_v45 = vadd.f32 %v799_v43, %v798_v41  ;;  %v809_v46 = vrot.slane %v808_v44, 2 }
 0x482   :  { %v801_v48 = vrot.slane %v800_v45, 1  ;;  %v810_v49 = vadd.f32 %v809_v46, %v808_v44 }
 0x484   :  { %v802_v50 = vadd.f32 %v801_v48, %v800_v45  ;;  %v811_v51 = vrot.slane %v810_v49, 1 }
 0x486   :  { %v804_v53 = vmul.f32 0.25, %v802_v50  ;;  %v812_v54 = vadd.f32 %v811_v51, %v810_v49 }
 0x488   :  { %v813_v55 = vmul.f32 0.25, %v812_v54  ;;  %v814_v56 = vmul.f32 %v804_v53, %v804_v53  ;;  %v817_v21 = vsub.f32 %v794_v33, %v804_v53 }
 0x48a   :  { %v815_v58 = vsub.f32 %v813_v55, %v814_v56 }
 0x48c   :  { %v816_v61 = vmax.f32 %v815_v58, 0.0 }
 0x48e   :  { %v818_v63 = vadd.f32 1e-05, %v816_v61 }
 0x490   :  { %2467 = vrsqrt.f32 %v818_v63  ;;  %v966_v1 = vpop.f32.mrb[8].mxu0  ;;  %v1038_v63 = vld [vmem:[#allocation12 + $0x16] ss:$8 sm:$0x3] }
 0x491   :  { %v2902_v2 = vadd.f32 %v966_v1, %v849_v62  ;;  %v968_v3 = vpop.f32.mrb[9].mxu0  ;;  %v1023_v62 = vld [vmem:[#allocation12 + $0x15] ss:$8 sm:$0x3] }
 0x492   :  { %v2904_v4 = vadd.f32 %v968_v3, %v853_v0  ;;  %v970_v5 = vpop.f32.mrb[10].mxu0  ;;  %v1028_v1 = vrot.slane %v1023_v62, %v2896_v57 }
 0x493   :  { %v973_v19 = vsel %vm925_vm12, %v2902_v2, 0.0  ;;  %v990_v6 = vmul.f32 %v2902_v2, %v2902_v2  ;;  %v971_v7 = vpop.f32.mrb[11].mxu0 }
 0x494   :  { %v974_v8 = vrot.slane %v973_v19, 4  ;;  %v980_v9 = vsel %vm925_vm12, %v2904_v4, 0.0  ;;  %v991_v10 = vmul.f32 %v2904_v4, %v2904_v4 }
 0x495   :  { %v992_v11 = vsel %vm925_vm12, %v990_v6, 0.0  ;;  %v981_v12 = vrot.slane %v980_v9, 4 }
 0x496   :  { %v975_v13 = vadd.f32 %v974_v8, %v973_v19  ;;  %v993_v14 = vrot.slane %v992_v11, 4  ;;  %v999_v15 = vsel %vm925_vm12, %v991_v10, 0.0  ;;  %v1032_v19 = vrot.slane %v1023_v62, %v2898_v60 }
 0x497   :  { %v982_v16 = vadd.f32 %v981_v12, %v980_v9  ;;  %v1000_v17 = vrot.slane %v999_v15, 4  ;;  %v1043_v8 = vrot.slane %v1038_v63, %v2896_v57  ;;  %v1047_v10 = vrot.slane %v1038_v63, %v2898_v60  ;;  %v2382_v60 = vld [vmem:[%s3093_s5 + $0x170] ss:$8 sps:$4 sm:$0xff]  }
 0x498   :  { %v976_v18 = vrot.slane %v975_v13, 2  ;;  %v994_v20 = vadd.f32 %v993_v14, %v992_v11 }
 0x499   :  { %v983_v22 = vrot.slane %v982_v16, 2  ;;  %v1001_v23 = vadd.f32 %v1000_v17, %v999_v15  ;;  %v1570_v17 = vld [vmem:[#allocation3] sm:$0xff] }
 0x49a   :  { %v2468_v24 = vpop.eup %2467  ;;  %v977_v25 = vadd.f32 %v976_v18, %v975_v13  ;;  %v995_v26 = vrot.slane %v994_v20, 2  ;;  %v1571_v18 = vld [vmem:[#allocation3 + $0x8] sm:$0xff] }
 0x49b   :  { %v820_v28 = vmul.f32 %v2468_v24, %v817_v21  ;;  %v984_v29 = vadd.f32 %v983_v22, %v982_v16  ;;  %v1002_v30 = vrot.slane %v1001_v23, 2  ;;  %v1573_v57 = vpack.c.bf16 %v1571_v18, %v1570_v17  ;;  %v2384_v22 = vld [vmem:[%s3093_s5 + $0x174] ss:$8 sps:$4 sm:$0xff]   ;;  %v2385_v24 = vld [vmem:[%s3093_s5 + $0x180] ss:$8 sps:$4 sm:$0xff]  }
 0x49c   :  { %v978_v31 = vrot.slane %v977_v25, 1  ;;  %v996_v32 = vadd.f32 %v995_v26, %v994_v20  ;;  %1482 = vmatprep.subr.bf16.mxu0 %v2384_v22  ;;  %v2388_v26 = vld [vmem:[%s3093_s5 + $0x190] ss:$8 sps:$4 sm:$0xff]   ;;  %v1829_v17 = vld [vmem:[#allocation2] sm:$0xff]  ;;  %v1830_v18 = vld [vmem:[#allocation2 + $0x8] sm:$0xff] }
 0x49d   :  { %v985_v35 = vrot.slane %v984_v29, 1  ;;  %v1003_v36 = vadd.f32 %v1002_v30, %v1001_v23  ;;  %v822_v37 = vmul.f32 %v821_v27, %v820_v28  ;;  %v2387_v23 = vld [vmem:[%s3093_s5 + $0x184] ss:$8 sps:$4 sm:$0xff]   ;;  %1483 = vmatpush1.bf16.msra.mxu0 %v2382_v60  ;;  %v2391_v28 = vld [vmem:[%s3093_s5 + $0x1a0] ss:$8 sps:$4 sm:$0xff]  }
 0x49e   :  { %v979_v38 = vadd.f32 %v978_v31, %v977_v25  ;;  %v997_v39 = vrot.slane %v996_v32, 1  ;;  %1484 = vmatprep.subr.bf16.mxu0 %v2387_v23  ;;  %v2390_v25 = vld [vmem:[%s3093_s5 + $0x194] ss:$8 sps:$4 sm:$0xff]   ;;  %v2393_v27 = vld [vmem:[%s3093_s5 + $0x1a4] ss:$8 sps:$4 sm:$0xff]  }
 0x49f   :  { %v986_v41 = vadd.f32 %v985_v35, %v984_v29  ;;  %v1004_v42 = vrot.slane %v1003_v36, 1  ;;  %v824_v33 = vadd.f32 %v823_v34, %v822_v37  ;;  %v2396_v29 = vld [vmem:[%s3093_s5 + $0x1b4] ss:$8 sps:$4 sm:$0xff]   ;;  %v2394_v30 = vld [vmem:[%s3093_s5 + $0x1b0] ss:$8 sps:$4 sm:$0xff]  }
 0x4a0   :  { %v988_v43 = vmul.f32 0.5, %v979_v38  ;;  %v998_v44 = vadd.f32 %v997_v39, %v996_v32  ;;  %v2399_v31 = vld [vmem:[%s3093_s5 + $0x1c4] ss:$8 sps:$4 sm:$0xff]   ;;  %v2397_v32 = vld [vmem:[%s3093_s5 + $0x1c0] ss:$8 sps:$4 sm:$0xff]  }
 0x4a1   :  { %v989_v45 = vmul.f32 0.5, %v986_v41  ;;  %v1005_v46 = vadd.f32 %v1004_v42, %v1003_v36  ;;  %vm825_vm15 = vcmp.gt.f32.partialorder %v824_v33, 0.0  ;;  %v826_v47 = vmul.f32 0.2, %v824_v33  ;;  %1485 = vmatpush1.bf16.msra.mxu0 %v2385_v24  ;;  %v2402_v34 = vld [vmem:[%s3093_s5 + $0x1d4] ss:$8 sps:$4 sm:$0xff]  }
 0x4a2   :  { %v1006_v48 = vmul.f32 0.5, %v998_v44  ;;  %v1008_v49 = vmul.f32 %v988_v43, %v988_v43  ;;  %v1014_v0 = vsub.f32 %v2902_v2, %v988_v43  ;;  %1486 = vmatprep.subr.bf16.mxu0 %v2390_v25  ;;  %v2400_v35 = vld [vmem:[%s3093_s5 + $0x1d0] ss:$8 sps:$4 sm:$0xff]   ;;  %v2405_v36 = vld [vmem:[%s3093_s5 + $0x1e4] ss:$8 sps:$4 sm:$0xff]  }
 0x4a3   :  { %v1007_v50 = vmul.f32 0.5, %v1005_v46  ;;  %v1009_v51 = vmul.f32 %v989_v45, %v989_v45  ;;  %v827_v52 = vsel %vm825_vm15, %v824_v33, %v826_v47  ;;  %v1015_v5 = vsub.f32 %v2904_v4, %v989_v45  ;;  %v2403_v37 = vld [vmem:[%s3093_s5 + $0x1e0] ss:$8 sps:$4 sm:$0xff]   ;;  %v2408_v38 = vld [vmem:[%s3093_s5 + $0x1f4] ss:$8 sps:$4 sm:$0xff]  }
 0x4a4   :  { %v1010_v53 = vsub.f32 %v1006_v48, %v1008_v49  ;;  %v1063_v54 = vpack.c.bf16 %v827_v52, %v827_v52  ;;  %v2406_v39 = vld [vmem:[%s3093_s5 + $0x1f0] ss:$8 sps:$4 sm:$0xff]   ;;  %v2411_v41 = vld [vmem:[%s3093_s5 + $0x204] ss:$8 sps:$4 sm:$0xff]   ;;  %v2409_v42 = vld [vmem:[%s3093_s5 + $0x200] ss:$8 sps:$4 sm:$0xff]  }
 0x4a5   :  { %v1011_v55 = vsub.f32 %v1007_v50, %v1009_v51  ;;  %1487 = vmatpush1.bf16.msra.mxu0 %v2388_v26  ;;  %v2414_v33 = vld [vmem:[%s3093_s5 + $0x214] ss:$8 sps:$4 sm:$0xff]   ;;  %v2412_v43 = vld [vmem:[%s3093_s5 + $0x210] ss:$8 sps:$4 sm:$0xff]   ;;  %v2417_v44 = vld [vmem:[%s3093_s5 + $0x224] ss:$8 sps:$4 sm:$0xff]  }
 0x4a6   :  { %v1012_v56 = vmax.f32 %v1010_v53, 0.0  ;;  %1288 = vmatprep.mubr.bf16.mxu1 %v1063_v54  ;;  %1488 = vmatprep.subr.bf16.mxu0 %v2393_v27  ;;  %v2415_v45 = vld [vmem:[%s3093_s5 + $0x220] ss:$8 sps:$4 sm:$0xff]   ;;  %v2418_v60 = vld [vmem:[%s3093_s5 + $0x230] ss:$8 sps:$4 sm:$0xff]  }
 0x4a7   :  { %v1013_v58 = vmax.f32 %v1011_v55, 0.0  ;;  %v1301_v50 = vld [vmem:[#allocation12 + $0x17] ss:$0 sm:$0xff]  ;;  %v2420_v22 = vld [vmem:[%s3093_s5 + $0x234] ss:$8 sps:$4 sm:$0xff]  }
 0x4a8   :  { %v1016_v59 = vadd.f32 1e-05, %v1012_v56  ;;  %v2423_v23 = vld [vmem:[%s3093_s5 + $0x244] ss:$8 sps:$4 sm:$0xff]   ;;  %1709 = vmatprep.subr.bf16.mxu1 %v2420_v22  ;;  %v2421_v24 = vld [vmem:[%s3093_s5 + $0x240] ss:$8 sps:$4 sm:$0xff]  }
 0x4a9   :  { %v1017_v61 = vadd.f32 1e-05, %v1013_v58  ;;  %1489 = vmatpush1.bf16.msra.mxu0 %v2391_v28  ;;  %v2426_v25 = vld [vmem:[%s3093_s5 + $0x254] ss:$8 sps:$4 sm:$0xff]   ;;  %v2424_v26 = vld [vmem:[%s3093_s5 + $0x250] ss:$8 sps:$4 sm:$0xff]  }
 0x4aa   :  { %2469 = vrsqrt.f32 %v1016_v59  ;;  %1490 = vmatprep.subr.bf16.mxu0 %v2396_v29  ;;  %v2429_v27 = vld [vmem:[%s3093_s5 + $0x264] ss:$8 sps:$4 sm:$0xff]   ;;  %v2427_v28 = vld [vmem:[%s3093_s5 + $0x260] ss:$8 sps:$4 sm:$0xff]   ;;  %v2432_v29 = vld [vmem:[%s3093_s5 + $0x274] ss:$8 sps:$4 sm:$0xff]  }
 0x4ab   :  { %2471 = vrsqrt.f32 %v1017_v61 }
 0x4ad   :  { %1491 = vmatpush1.bf16.msra.mxu0 %v2394_v30  ;;  %v2430_v30 = vld [vmem:[%s3093_s5 + $0x270] ss:$8 sps:$4 sm:$0xff]  }
 0x4ae   :  { %1492 = vmatprep.subr.bf16.mxu0 %v2399_v31  ;;  %v2435_v31 = vld [vmem:[%s3093_s5 + $0x284] ss:$8 sps:$4 sm:$0xff]  }
 0x4b1   :  { %1493 = vmatpush1.bf16.msra.mxu0 %v2397_v32  ;;  %v2433_v32 = vld [vmem:[%s3093_s5 + $0x280] ss:$8 sps:$4 sm:$0xff]  }
 0x4b2   :  { %1494 = vmatprep.subr.bf16.mxu0 %v2402_v34  ;;  %v2438_v34 = vld [vmem:[%s3093_s5 + $0x294] ss:$8 sps:$4 sm:$0xff]  }
 0x4b4   :  { %v2470_v3 = vpop.eup %2469 }
 0x4b5   :  { %v2472_v6 = vpop.eup %2471  ;;  %v1020_v7 = vmul.f32 %v2470_v3, %v1014_v0  ;;  %1495 = vmatpush1.bf16.msra.mxu0 %v2400_v35  ;;  %v2436_v35 = vld [vmem:[%s3093_s5 + $0x290] ss:$8 sps:$4 sm:$0xff]  }
 0x4b6   :  { %v1021_v9 = vmul.f32 %v2472_v6, %v1015_v5  ;;  %1496 = vmatprep.subr.bf16.mxu0 %v2405_v36  ;;  %v2441_v36 = vld [vmem:[%s3093_s5 + $0x2a4] ss:$8 sps:$4 sm:$0xff]  }
 0x4b7   :  { %v1035_v11 = vmul.f32 %v1028_v1, %v1020_v7 }
 0x4b8   :  { %v1036_v12 = vmul.f32 %v1032_v19, %v1021_v9 }
 0x4b9   :  { %v1050_v13 = vadd.f32 %v1043_v8, %v1035_v11  ;;  %1497 = vmatpush1.bf16.msra.mxu0 %v2403_v37  ;;  %v2439_v37 = vld [vmem:[%s3093_s5 + $0x2a0] ss:$8 sps:$4 sm:$0xff]  }
 0x4ba   :  { %v1051_v14 = vadd.f32 %v1047_v10, %v1036_v12  ;;  %1498 = vmatprep.subr.bf16.mxu0 %v2408_v38  ;;  %v2444_v38 = vld [vmem:[%s3093_s5 + $0x2b4] ss:$8 sps:$4 sm:$0xff]  }
 0x4bb   :  { %vm1052_vm0 = vcmp.gt.f32.partialorder %v1050_v13, 0.0  ;;  %v1054_v2 = vmul.f32 0.2, %v1050_v13 }
 0x4bc   :  { %vm1053_vm1 = vcmp.gt.f32.partialorder %v1051_v14, 0.0  ;;  %v1055_v15 = vmul.f32 0.2, %v1051_v14 }
 0x4bd   :  { %v1056_v16 = vsel %vm1052_vm0, %v1050_v13, %v1054_v2  ;;  %1499 = vmatpush1.bf16.msra.mxu0 %v2406_v39  ;;  %v1325_v13 = vld [vmem:[#allocation12 + $0x20] ss:$0 sm:$0xff]  ;;  %v1327_v2 = vld [vmem:[#allocation12 + $0x21] ss:$0 sm:$0xff]  ;;  %v2442_v39 = vld [vmem:[%s3093_s5 + $0x2b0] ss:$8 sps:$4 sm:$0xff]  }
 0x4be   :  { %1058 = vst [vmem:[#allocation5] ss:$2 sm:$0x3] %v1056_v16  ;;  %v1057_v4 = vsel %vm1053_vm1, %v1051_v14, %v1055_v15  ;;  %1500 = vmatprep.subr.bf16.mxu0 %v2411_v41  ;;  %v2447_v41 = vld [vmem:[%s3093_s5 + $0x2c4] ss:$8 sps:$4 sm:$0xff]  }
 0x4bf   :  { %1060 = vst [vmem:[#allocation5 + $0x1] ss:$2 sm:$0x3] %v1057_v4 }
 0x4c1   :  { %1501 = vmatpush1.bf16.msra.mxu0 %v2409_v42  ;;  %v2445_v42 = vld [vmem:[%s3093_s5 + $0x2c0] ss:$8 sps:$4 sm:$0xff]  }
 0x4c2   :  { %1502 = vmatprep.subr.bf16.mxu0 %v2414_v33  ;;  %v2450_v33 = vld [vmem:[%s3093_s5 + $0x2d4] ss:$8 sps:$4 sm:$0xff]  }
 0x4c5   :  { %1503 = vmatpush1.bf16.msra.mxu0 %v2412_v43  ;;  %v2448_v43 = vld [vmem:[%s3093_s5 + $0x2d0] ss:$8 sps:$4 sm:$0xff]   ;;  %s2601_s5 = smov [#allocation15]  }
 0x4c6   :  { %v1061_v20 = vld [vmem:[#allocation5] sm:$0xf]  ;;  %1504 = vmatprep.subr.bf16.mxu0 %v2417_v44  ;;  %s2004_s17 = sshll.u32 %s2601_s5, 4  ;;  %s2005_s17 = int_to_ptr.vmem [resolvable:$true] %s2004_s17 }
 0x4c7   :  { %v1062_v21 = vpack.c.bf16 %v1061_v20, %v1061_v20  ;;  %s2561_s18 = scalar_lea.vmem %s2005_s17, 512  ;;  %p2566_p11 = scmp.lt.s32.totalorder %s2005_s17, %s2005_s17 }
 0x4c8   :  { %p2562_p10 = scmp.ne.s32.totalorder %s2005_s17, %s2561_s18  ;;  %p2567_p12 = scmp.lt.s32.totalorder %s2561_s18, %s2561_s18 }
 0x4c9   :  { %1289 = vmatmul.mubr.bf16.vlgmr.msra.gmra.mrb[20].mxu1 %v1062_v21  ;;  %1505 = vmatpush1.bf16.msra.mxu0 %v2415_v45 }
 0x4ca   :  { %2144 = vmatprep.mubr.msk.bf16.mxu1 %vm416_vm7, %v1573_v57  ;;  %1922 = vmatprep.subr.bf16.mxu0 %v2600_v40  ;;  %v1833_v57 = vpack.c.bf16 %v1830_v18, %v1829_v17  ;;  %v1561_v18 = vld [vmem:[#allocation12 + $0x24] ss:$0 sm:$0xff]  ;;  %p2568_p13 = por %p2567_p12, %p2566_p11 }
 0x4cb   :  { %1710 = vmatpush1.bf16.msra.mxu1 %v2418_v60 }
 0x4cc   :  { %1711 = vmatprep.subr.bf16.mxu1 %v2423_v23  ;;  %p2569_p0 = pnand %p2568_p13, %p2562_p10 }
 0x4cf   :  { %1712 = vmatpush1.bf16.msra.mxu1 %v2421_v24 }
 0x4d0   :  { %1713 = vmatprep.subr.bf16.mxu1 %v2426_v25 }
 0x4d3   :  { %1714 = vmatpush1.bf16.msra.mxu1 %v2424_v26 }
 0x4d4   :  { %1715 = vmatprep.subr.bf16.mxu1 %v2429_v27  ;;  %v2451_v27 = vld [vmem:[#allocation14 + $0xd0] sm:$0xff]  }
 0x4d7   :  { %1716 = vmatpush1.bf16.msra.mxu1 %v2427_v28  ;;  %v2452_v28 = vld [vmem:[#allocation14 + $0xd8] sm:$0xff]  }
 0x4d8   :  { %1717 = vmatprep.subr.bf16.mxu1 %v2432_v29  ;;  %v2453_v29 = vld [vmem:[#allocation14 + $0xe0] sm:$0xff]  }
 0x4db   :  { %1718 = vmatpush1.bf16.msra.mxu1 %v2430_v30  ;;  %v2454_v30 = vld [vmem:[#allocation14 + $0xe8] sm:$0xff]  }
 0x4dc   :  { %1719 = vmatprep.subr.bf16.mxu1 %v2435_v31  ;;  %v2455_v31 = vld [vmem:[#allocation14 + $0xf0] sm:$0xff]  }
 0x4df   :  { %1720 = vmatpush1.bf16.msra.mxu1 %v2433_v32  ;;  %v2456_v32 = vld [vmem:[#allocation14 + $0xf8] sm:$0xff]  }
 0x4e0   :  { %1721 = vmatprep.subr.bf16.mxu1 %v2438_v34  ;;  %v2457_v34 = vld [vmem:[#allocation14 + $0x100] sm:$0xff]  }
 0x4e3   :  { %1722 = vmatpush1.bf16.msra.mxu1 %v2436_v35  ;;  %v2458_v35 = vld [vmem:[#allocation14 + $0x108] sm:$0xff]  }
 0x4e4   :  { %1723 = vmatprep.subr.bf16.mxu1 %v2441_v36  ;;  %v2459_v36 = vld [vmem:[#allocation14 + $0x110] sm:$0xff]  }
 0x4e7   :  { %1724 = vmatpush1.bf16.msra.mxu1 %v2439_v37  ;;  %v2460_v37 = vld [vmem:[#allocation14 + $0x118] sm:$0xff]  }
 0x4e8   :  { %1725 = vmatprep.subr.bf16.mxu1 %v2444_v38 }
 0x4eb   :  { %1726 = vmatpush1.bf16.msra.mxu1 %v2442_v39 }
 0x4ec   :  { %1727 = vmatprep.subr.bf16.mxu1 %v2447_v41 }
 0x4ef   :  { %1728 = vmatpush1.bf16.msra.mxu1 %v2445_v42 }
 0x4f0   :  { %1729 = vmatprep.subr.bf16.mxu1 %v2450_v33  ;;  %v1763_v33 = vld [vmem:[#allocation12 + $0x25] ss:$0 sm:$0xff] }
 0x4f3   :  { %1730 = vmatpush1.bf16.msra.mxu1 %v2448_v43 }
 0x59c   :  { %v1290_v46 = vpop.f32.mrb[20].mxu1 }
 0x59d   :  { %1297 = vst [vmem:[#allocation6] ss:$2 sm:$0xf] %v1290_v46  ;;  %v1292_v47 = vpop.f32.mrb[21].mxu1 }
 0x59e   :  { %1299 = vst [vmem:[#allocation6 + $0x1] ss:$2 sm:$0xf] %v1292_v47  ;;  %v1294_v48 = vpop.f32.mrb[22].mxu1 }
 0x59f   :  { %v1295_v49 = vpop.f32.mrb[23].mxu1  ;;  %v1528_v48 = vld [vmem:[#allocation12 + $0x22] ss:$0 sm:$0xff] }
 0x5a5   :  { %v1300_v51 = vld [vmem:[#allocation6] sm:$0xff] }
 0x5a6   :  { %v1302_v52 = vadd.f32 %v1301_v50, %v1300_v51 }
 0x5a8   :  { %v1303_v53 = vrot.slane %v1302_v52, 4  ;;  %v1310_v54 = vmul.f32 %v1302_v52, %v1302_v52 }
 0x5aa   :  { %v1304_v55 = vadd.f32 %v1303_v53, %v1302_v52  ;;  %v1311_v56 = vrot.slane %v1310_v54, 4 }
 0x5ac   :  { %v1305_v58 = vrot.slane %v1304_v55, 2  ;;  %v1312_v59 = vadd.f32 %v1311_v56, %v1310_v54 }
 0x5ae   :  { %v1306_v61 = vadd.f32 %v1305_v58, %v1304_v55  ;;  %v1313_v62 = vrot.slane %v1312_v59, 2 }
 0x5b0   :  { %v1307_v63 = vrot.slane %v1306_v61, 1  ;;  %v1314_v0 = vadd.f32 %v1313_v62, %v1312_v59 }
 0x5b2   :  { %v1308_v1 = vadd.f32 %v1307_v63, %v1306_v61  ;;  %v1315_v3 = vrot.slane %v1314_v0, 1 }
 0x5b4   :  { %v1309_v5 = vmul.f32 0.125, %v1308_v1  ;;  %v1316_v19 = vadd.f32 %v1315_v3, %v1314_v0 }
 0x5b6   :  { %v1317_v6 = vmul.f32 0.125, %v1316_v19  ;;  %v1318_v7 = vmul.f32 %v1309_v5, %v1309_v5  ;;  %v1321_v11 = vsub.f32 %v1302_v52, %v1309_v5 }
 0x5b8   :  { %v1319_v8 = vsub.f32 %v1317_v6, %v1318_v7 }
 0x5ba   :  { %v1320_v9 = vmax.f32 %v1319_v8, 0.0 }
 0x5bc   :  { %v1322_v10 = vadd.f32 1e-05, %v1320_v9 }
 0x5be   :  { %2473 = vrsqrt.f32 %v1322_v10 }
 0x5c8   :  { %v2474_v12 = vpop.eup %2473 }
 0x5c9   :  { %v1324_v14 = vmul.f32 %v2474_v12, %v1321_v11 }
 0x5cb   :  { %v1326_v15 = vmul.f32 %v1325_v13, %v1324_v14 }
 0x5cd   :  { %v1328_v16 = vadd.f32 %v1327_v2, %v1326_v15 }
 0x5cf   :  { %vm1329_vm3 = vcmp.gt.f32.partialorder %v1328_v16, 0.0  ;;  %v1330_v4 = vmul.f32 0.2, %v1328_v16 }
 0x5d1   :  { %v1331_v20 = vsel %vm1329_vm3, %v1328_v16, %v1330_v4  ;;  %v1558_v16 = vld [vmem:[#allocation12 + $0x23] ss:$0 sm:$0xff] }
 0x5d2   :  { %v1333_v21 = vpack.c.bf16 %v1331_v20, %v1331_v20 }
 0x5d4   :  { %1515 = vmatmul.mubr.bf16.vlgmr.msra.gmra.mrb[12].mxu0 %v1333_v21 }
 0x5d5   :  { %2155 = vmatprep.mubr.msk.bf16.mxu0 %vm279_vm2, %v1833_v57  ;;  %1923 = vmatpush1.bf16.msra.mxu0 %v2451_v27 }
 0x5d6   :  { %1924 = vmatprep.subr.bf16.mxu0 %v2600_v40 }
 0x5d9   :  { %1925 = vmatpush1.bf16.msra.mxu0 %v2452_v28 }
 0x5da   :  { %1926 = vmatprep.subr.bf16.mxu0 %v2600_v40 }
 0x5dd   :  { %1927 = vmatpush1.bf16.msra.mxu0 %v2453_v29 }
 0x5de   :  { %1928 = vmatprep.subr.bf16.mxu0 %v2600_v40 }
 0x5e1   :  { %1929 = vmatpush1.bf16.msra.mxu0 %v2454_v30 }
 0x5e2   :  { %1930 = vmatprep.subr.bf16.mxu0 %v2600_v40 }
 0x5e5   :  { %1931 = vmatpush1.bf16.msra.mxu0 %v2455_v31 }
 0x5e6   :  { %1932 = vmatprep.subr.bf16.mxu0 %v2600_v40 }
 0x5e9   :  { %1933 = vmatpush1.bf16.msra.mxu0 %v2456_v32 }
 0x5ea   :  { %1934 = vmatprep.subr.bf16.mxu0 %v2600_v40 }
 0x5ed   :  { %1935 = vmatpush1.bf16.msra.mxu0 %v2457_v34 }
 0x5ee   :  { %1936 = vmatprep.subr.bf16.mxu0 %v2600_v40 }
 0x5f1   :  { %1937 = vmatpush1.bf16.msra.mxu0 %v2458_v35 }
 0x5f2   :  { %1938 = vmatprep.subr.bf16.mxu0 %v2600_v40 }
 0x5f5   :  { %1939 = vmatpush1.bf16.msra.mxu0 %v2459_v36  ;;  %v1831_v36 = vld [vmem:[#allocation2 + $0x10] sm:$0xff] }
 0x5f6   :  { %1940 = vmatprep.subr.bf16.mxu0 %v2600_v40 }
 0x5f9   :  { %1941 = vmatpush1.bf16.msra.mxu0 %v2460_v37  ;;  %v1832_v37 = vld [vmem:[#allocation2 + $0x18] sm:$0xff] }
 0x6a7   :  { %v1516_v44 = vpop.f32.mrb[12].mxu0 }
 0x6a8   :  { %1523 = vst [vmem:[#allocation7] ss:$2 sm:$0xff] %v1516_v44  ;;  %v1518_v45 = vpop.f32.mrb[13].mxu0 }
 0x6a9   :  { %1525 = vst [vmem:[#allocation7 + $0x1] ss:$2 sm:$0xff] %v1518_v45  ;;  %v1520_v46 = vpop.f32.mrb[14].mxu0 }
 0x6aa   :  { %v1521_v47 = vpop.f32.mrb[15].mxu0 }
 0x6b0   :  { %v1526_v49 = vld [vmem:[#allocation7] sm:$0xff]  ;;  %v1527_v50 = vld [vmem:[#allocation7 + $0x8] sm:$0xff] }
 0x6b1   :  { %v1529_v51 = vadd.f32 %v1528_v48, %v1526_v49  ;;  %v1530_v52 = vadd.f32 %v1528_v48, %v1527_v50 }
 0x6b3   :  { %v1531_v53 = vadd.f32 %v1530_v52, %v1529_v51  ;;  %v1539_v54 = vmul.f32 %v1529_v51, %v1529_v51  ;;  %v1540_v55 = vmul.f32 %v1530_v52, %v1530_v52 }
 0x6b5   :  { %v1532_v56 = vrot.slane %v1531_v53, 4  ;;  %v1541_v58 = vadd.f32 %v1540_v55, %v1539_v54 }
 0x6b7   :  { %v1533_v59 = vadd.f32 %v1532_v56, %v1531_v53  ;;  %v1542_v61 = vrot.slane %v1541_v58, 4 }
 0x6b9   :  { %v1534_v62 = vrot.slane %v1533_v59, 2  ;;  %v1543_v63 = vadd.f32 %v1542_v61, %v1541_v58 }
 0x6bb   :  { %v1535_v0 = vadd.f32 %v1534_v62, %v1533_v59  ;;  %v1544_v1 = vrot.slane %v1543_v63, 2 }
 0x6bd   :  { %v1536_v3 = vrot.slane %v1535_v0, 1  ;;  %v1545_v5 = vadd.f32 %v1544_v1, %v1543_v63 }
 0x6bf   :  { %v1537_v19 = vadd.f32 %v1536_v3, %v1535_v0  ;;  %v1546_v6 = vrot.slane %v1545_v5, 1 }
 0x6c1   :  { %v1538_v7 = vmul.f32 0.0625, %v1537_v19  ;;  %v1547_v8 = vadd.f32 %v1546_v6, %v1545_v5 }
 0x6c3   :  { %v1548_v9 = vmul.f32 0.0625, %v1547_v8  ;;  %v1549_v10 = vmul.f32 %v1538_v7, %v1538_v7  ;;  %v1552_v14 = vsub.f32 %v1529_v51, %v1538_v7  ;;  %v1553_v2 = vsub.f32 %v1530_v52, %v1538_v7 }
 0x6c5   :  { %v1550_v11 = vsub.f32 %v1548_v9, %v1549_v10 }
 0x6c7   :  { %v1551_v12 = vmax.f32 %v1550_v11, 0.0 }
 0x6c9   :  { %v1554_v13 = vadd.f32 1e-05, %v1551_v12 }
 0x6cb   :  { %2475 = vrsqrt.f32 %v1554_v13 }
 0x6d5   :  { %v2476_v15 = vpop.eup %2475 }
 0x6d6   :  { %v1556_v4 = vmul.f32 %v2476_v15, %v1552_v14  ;;  %v1557_v17 = vmul.f32 %v2476_v15, %v1553_v2 }
 0x6d8   :  { %v1559_v20 = vmul.f32 %v1558_v16, %v1556_v4  ;;  %v1560_v21 = vmul.f32 %v1558_v16, %v1557_v17 }
 0x6da   :  { %v1562_v57 = vadd.f32 %v1561_v18, %v1559_v20  ;;  %v1563_v60 = vadd.f32 %v1561_v18, %v1560_v21  ;;  %v1805_v21 = vld [vmem:[#allocation12 + $0x26] ss:$0 sm:$0xff] }
 0x6dc   :  { %vm1564_vm4 = vcmp.gt.f32.partialorder %v1562_v57, 0.0  ;;  %vm1565_vm5 = vcmp.gt.f32.partialorder %v1563_v60, 0.0  ;;  %v1566_v22 = vmul.f32 0.2, %v1562_v57  ;;  %v1567_v23 = vmul.f32 0.2, %v1563_v60 }
 0x6de   :  { %v1568_v24 = vsel %vm1564_vm4, %v1562_v57, %v1566_v22  ;;  %v1569_v25 = vsel %vm1565_vm5, %v1563_v60, %v1567_v23 }
 0x6df   :  { %v1572_v26 = vpack.c.bf16 %v1569_v25, %v1568_v24  ;;  %v1810_v24 = vld [vmem:[#allocation12 + $0x27] ss:$0 sm:$0xff] }
 0x6e1   :  { %1742 = vmatmul.mubr.bf16.vlgmr.msra.gmra.mrb[24].mxu1 %v1572_v26 }
 0x7b4   :  { %v1743_v38 = vpop.f32.mrb[24].mxu1 }
 0x7b5   :  { %1752 = vst [vmem:[#allocation8] ss:$2 sm:$0xff] %v1743_v38  ;;  %v1745_v39 = vpop.f32.mrb[25].mxu1 }
 0x7b6   :  { %1756 = vst [vmem:[#allocation8 + $0x1] ss:$2 sm:$0xff] %v1745_v39  ;;  %v1747_v41 = vpop.f32.mrb[26].mxu1 }
 0x7b7   :  { %1754 = vst [vmem:[#allocation8 + $0x10] ss:$2 sm:$0xff] %v1747_v41  ;;  %v1749_v42 = vpop.f32.mrb[27].mxu1 }
 0x7b8   :  { %1758 = vst [vmem:[#allocation8 + $0x11] ss:$2 sm:$0xff] %v1749_v42  ;;  %v1834_v42 = vpack.c.bf16 %v1832_v37, %v1831_v36 }
 0x7bd   :  { %v1759_v43 = vld [vmem:[#allocation8] sm:$0xff]  ;;  %v1760_v44 = vld [vmem:[#allocation8 + $0x8] sm:$0xff] }
 0x7be   :  { %v1764_v45 = vadd.f32 %v1763_v33, %v1759_v43  ;;  %v1765_v46 = vadd.f32 %v1763_v33, %v1760_v44 }
 0x7bf   :  { %v1761_v47 = vld [vmem:[#allocation8 + $0x10] sm:$0xff]  ;;  %v1762_v48 = vld [vmem:[#allocation8 + $0x18] sm:$0xff] }
 0x7c0   :  { %v1766_v49 = vadd.f32 %v1763_v33, %v1761_v47  ;;  %v1768_v50 = vadd.f32 %v1765_v46, %v1764_v45  ;;  %v1778_v51 = vmul.f32 %v1764_v45, %v1764_v45  ;;  %v1767_v40 = vadd.f32 %v1763_v33, %v1762_v48  ;;  %v1855_v47 = vld [vmem:[#allocation12 + $0x30] ss:$0 sm:$0xff] }
 0x7c1   :  { %v1779_v52 = vmul.f32 %v1765_v46, %v1765_v46 }
 0x7c2   :  { %v1769_v53 = vadd.f32 %v1768_v50, %v1766_v49  ;;  %v1780_v54 = vmul.f32 %v1766_v49, %v1766_v49  ;;  %v1781_v58 = vmul.f32 %v1767_v40, %v1767_v40 }
 0x7c3   :  { %v1782_v55 = vadd.f32 %v1779_v52, %v1778_v51 }
 0x7c4   :  { %v1770_v56 = vadd.f32 %v1769_v53, %v1767_v40 }
 0x7c5   :  { %v1783_v59 = vadd.f32 %v1782_v55, %v1780_v54 }
 0x7c6   :  { %v1771_v61 = vrot.slane %v1770_v56, 4 }
 0x7c7   :  { %v1784_v62 = vadd.f32 %v1783_v59, %v1781_v58 }
 0x7c8   :  { %v1772_v63 = vadd.f32 %v1771_v61, %v1770_v56 }
 0x7c9   :  { %v1785_v0 = vrot.slane %v1784_v62, 4 }
 0x7ca   :  { %v1773_v1 = vrot.slane %v1772_v63, 2 }
 0x7cb   :  { %v1786_v3 = vadd.f32 %v1785_v0, %v1784_v62 }
 0x7cc   :  { %v1774_v5 = vadd.f32 %v1773_v1, %v1772_v63 }
 0x7cd   :  { %v1787_v19 = vrot.slane %v1786_v3, 2 }
 0x7ce   :  { %v1775_v6 = vrot.slane %v1774_v5, 1 }
 0x7cf   :  { %v1788_v7 = vadd.f32 %v1787_v19, %v1786_v3 }
 0x7d0   :  { %v1776_v8 = vadd.f32 %v1775_v6, %v1774_v5 }
 0x7d1   :  { %v1789_v9 = vrot.slane %v1788_v7, 1 }
 0x7d2   :  { %v1777_v10 = vmul.f32 0.03125, %v1776_v8 }
 0x7d3   :  { %v1790_v11 = vadd.f32 %v1789_v9, %v1788_v7 }
 0x7d4   :  { %v1792_v12 = vmul.f32 %v1777_v10, %v1777_v10  ;;  %v1795_v16 = vsub.f32 %v1764_v45, %v1777_v10  ;;  %v1796_v4 = vsub.f32 %v1765_v46, %v1777_v10  ;;  %v1797_v17 = vsub.f32 %v1766_v49, %v1777_v10 }
 0x7d5   :  { %v1791_v13 = vmul.f32 0.03125, %v1790_v11  ;;  %v1798_v18 = vsub.f32 %v1767_v40, %v1777_v10 }
 0x7d7   :  { %v1793_v14 = vsub.f32 %v1791_v13, %v1792_v12 }
 0x7d9   :  { %v1794_v2 = vmax.f32 %v1793_v14, 0.0 }
 0x7db   :  { %v1799_v15 = vadd.f32 1e-05, %v1794_v2 }
 0x7dd   :  { %2477 = vrsqrt.f32 %v1799_v15 }
 0x7e7   :  { %v2478_v20 = vpop.eup %2477 }
 0x7e8   :  { %v1801_v57 = vmul.f32 %v2478_v20, %v1795_v16  ;;  %v1802_v60 = vmul.f32 %v2478_v20, %v1796_v4  ;;  %v1803_v22 = vmul.f32 %v2478_v20, %v1797_v17  ;;  %v1804_v23 = vmul.f32 %v2478_v20, %v1798_v18 }
 0x7ea   :  { %v1806_v25 = vmul.f32 %v1805_v21, %v1801_v57  ;;  %v1807_v26 = vmul.f32 %v1805_v21, %v1802_v60  ;;  %v1808_v27 = vmul.f32 %v1805_v21, %v1803_v22  ;;  %v1809_v28 = vmul.f32 %v1805_v21, %v1804_v23 }
 0x7ec   :  { %v1811_v29 = vadd.f32 %v1810_v24, %v1806_v25  ;;  %v1812_v30 = vadd.f32 %v1810_v24, %v1807_v26  ;;  %v1813_v31 = vadd.f32 %v1810_v24, %v1808_v27  ;;  %v1814_v32 = vadd.f32 %v1810_v24, %v1809_v28 }
 0x7ee   :  { %vm1815_vm6 = vcmp.gt.f32.partialorder %v1811_v29, 0.0  ;;  %vm1816_vm7 = vcmp.gt.f32.partialorder %v1812_v30, 0.0  ;;  %v1819_v34 = vmul.f32 0.2, %v1811_v29  ;;  %v1820_v35 = vmul.f32 0.2, %v1812_v30 }
 0x7ef   :  { %v1821_v33 = vmul.f32 0.2, %v1813_v31  ;;  %v1822_v43 = vmul.f32 0.2, %v1814_v32  ;;  %vm1817_vm8 = vcmp.gt.f32.partialorder %v1813_v31, 0.0  ;;  %vm1818_vm9 = vcmp.gt.f32.partialorder %v1814_v32, 0.0 }
 0x7f0   :  { %v1823_v38 = vsel %vm1815_vm6, %v1811_v29, %v1819_v34  ;;  %v1824_v39 = vsel %vm1816_vm7, %v1812_v30, %v1820_v35 }
 0x7f1   :  { %v1827_v41 = vpack.c.bf16 %v1824_v39, %v1823_v38  ;;  %v1825_v44 = vsel %vm1817_vm8, %v1813_v31, %v1821_v33  ;;  %v1826_v45 = vsel %vm1818_vm9, %v1814_v32, %v1822_v43 }
 0x7f2   :  { %v1828_v46 = vpack.c.bf16 %v1826_v45, %v1825_v44 }
 0x7f3   :  { %1955 = vmatmul.mubr.bf16.vlgmr.msra.gmra.mrb[16].mxu0 %v1827_v41 }
 0x7f4   :  { %2156 = vmatprep.mubr.msk.bf16.mxu0 %vm279_vm2, %v1834_v42 }
 0x7fb   :  { %1963 = vmatmul.mubr.bf16.gmra.mrb[20].mxu0 %v1828_v46 }
 0x8c6   :  { %v1956_v48 = vpop.f32.mrb[16].mxu0 }
 0x8c7   :  { %v1957_v49 = vadd.f32 %v1956_v48, %v1855_v47  ;;  %v1958_v50 = vpop.f32.mrb[17].mxu0 }
 0x8c8   :  { %v1959_v51 = vpop.f32.mrb[18].mxu0 }
 0x8c9   :  { %v2157_v40 = vmul.f32 -1.442695, %v1957_v49  ;;  %v1960_v52 = vadd.f32 %v1959_v51, %v1855_v47  ;;  %v1961_v53 = vpop.f32.mrb[19].mxu0 }
 0x8cb   :  { %2479 = vpow2.f32 %v2157_v40  ;;  %v2158_v54 = vmul.f32 -1.442695, %v1960_v52 }
 0x8cd   :  { %2481 = vpow2.f32 %v2158_v54 }
 0x8ce   :  { %v1964_v55 = vpop.f32.mrb[20].mxu0 }
 0x8cf   :  { %v1965_v56 = vadd.f32 %v1964_v55, %v1855_v47  ;;  %v1966_v58 = vpop.f32.mrb[21].mxu0 }
 0x8d0   :  { %v1967_v59 = vpop.f32.mrb[22].mxu0 }
 0x8d1   :  { %v2159_v61 = vmul.f32 -1.442695, %v1965_v56  ;;  %v1968_v62 = vadd.f32 %v1967_v59, %v1855_v47  ;;  %v1969_v63 = vpop.f32.mrb[23].mxu0 }
 0x8d3   :  { %2483 = vpow2.f32 %v2159_v61  ;;  %v2160_v0 = vmul.f32 -1.442695, %v1968_v62 }
 0x8d5   :  { %v2480_v1 = vpop.eup %2479  ;;  %2485 = vpow2.f32 %v2160_v0 }
 0x8d6   :  { %v1983_v3 = vadd.f32 1.0, %v2480_v1 }
 0x8d7   :  { %v2482_v5 = vpop.eup %2481 }
 0x8d8   :  { %2487 = vrcp.f32 %v1983_v3  ;;  %v1984_v19 = vadd.f32 1.0, %v2482_v5 }
 0x8da   :  { %2489 = vrcp.f32 %v1984_v19 }
 0x8dd   :  { %v2484_v6 = vpop.eup %2483 }
 0x8de   :  { %v1985_v7 = vadd.f32 1.0, %v2484_v6 }
 0x8df   :  { %v2486_v8 = vpop.eup %2485 }
 0x8e0   :  { %2491 = vrcp.f32 %v1985_v7  ;;  %v1986_v9 = vadd.f32 1.0, %v2486_v8 }
 0x8e2   :  { %v2488_v10 = vpop.eup %2487  ;;  %2493 = vrcp.f32 %v1986_v9 }
 0x8e3   :  { %1995 = vst [vmem:[#allocation15] sm:$0xff] %v2488_v10 }
 0x8e4   :  { %v2490_v11 = vpop.eup %2489 }
 0x8e5   :  { %1996 = vst [vmem:[#allocation15 + $0x8] sm:$0xff] %v2490_v11 }
 0x8ea   :  { %v2492_v12 = vpop.eup %2491 }
 0x8eb   :  { %1997 = vst [vmem:[#allocation15 + $0x10] sm:$0xff] %v2492_v12 }
 0x8ec   :  { %v2494_v13 = vpop.eup %2493 }
 0x8ed   :  { %1998 = vst [vmem:[#allocation15 + $0x18] sm:$0xff] %v2494_v13 }
 0x8ee   :  { %2572 = shalt.err (!%p2569_p0)
}
 0x8ef   :  { %s2573_s2 = scalar_lea.hbm %s3094_s6, 512 }
 0x8f0   :  { %p2574_p1 = scmp.ne.s32.totalorder %s3094_s6, %s2573_s2  ;;  %p2577_p2 = scmp.lt.u32.totalorder %s2573_s2, %s3094_s6 }
 0x8f2   :  { %p2579_p3 = pnand %p2577_p2, %p2574_p1 }
 0x8f4   :  { %2582 = shalt.err (!%p2579_p3)
}
 0x8f5   :  { %2010 = dma.vmem_to_hbm [thread:$0]  %s2005_s17, 512, %s3094_s6, [#allocation11], %s2593_s3, %s2593_s3, %s2594_s21  }
 0x8f6   :  { %2587 = dma.done.wait [#allocation11], 512  }
 0x8f7   :  { %2588 = vsyncadd [#allocation11], 4294966784 }
 0x8f8   :  { %2014 = vsyncpa [#allocation10], 1 }
 0x8f9   :  { %2015 = vsyncpa [#allocation13], 1 }
 0x8fa   :  { %2016 = vsyncpa [#allocation11], 1 }

</bundles_post_ra>
